<compile_context>
chip_gen: v5e
topology: v5e:2x2
jax: 0.10.0
libtpu: 0.0.40
codegen_flags: <defaults>
</compile_context>

<pallas_src>
import functools
import math

import jax
import jax.numpy as jnp
from jax.experimental import pallas as pl
from jax.experimental.pallas import tpu as pltpu

IN_FEATURES = 784        # 1 * 28 * 28
H1 = 512
H2 = 256
OUT_PAD = 128            # lane-dense padded output width (true output = column 0)


def _round_up(x, m):
    return ((x + m - 1) // m) * m


def _leaky_relu(x, negative_slope=0.2):
    # max(x, 0.2*x): 2 VPU ops instead of cmp + mul + select.
    return jnp.maximum(x, negative_slope * x)


def discriminator_kernel(x_ref, w1_ref, b1_ref, w2_ref, b2_ref, w3_ref, b3_ref,
                         out_ref):
    """One batch tile: three MXU matmuls + bias + activations, fully fused."""
    x = x_ref[...].astype(jnp.bfloat16)                                # (TB, 784)

    h = jnp.dot(x, w1_ref[...], preferred_element_type=jnp.float32)   # (TB, 512) f32
    h = _leaky_relu(h + b1_ref[...])

    h = jnp.dot(h.astype(jnp.bfloat16), w2_ref[...],
                preferred_element_type=jnp.float32)                   # (TB, 256) f32
    h = _leaky_relu(h + b2_ref[...])

    h = jnp.dot(h.astype(jnp.bfloat16), w3_ref[...],
                preferred_element_type=jnp.float32)                   # (TB, 128) f32
    h = h + b3_ref[...]

    # Sigmoid: exp on EUP; divide via EUP approx reciprocal (off the VPU).
    out_ref[...] = pl.reciprocal(1.0 + jnp.exp(-h), approx=True)


def init_discriminator_params(key):
    """PyTorch nn.Linear default init (uniform +/- 1/sqrt(fan_in)).

    Weights stored as (in, out) — transposed vs. PyTorch's (out, in)."""
    layer_dims = [(IN_FEATURES, H1), (H1, H2), (H2, 1)]
    params = []
    for fan_in, fan_out in layer_dims:
        key, kw, kb = jax.random.split(key, 3)
        bound = 1.0 / math.sqrt(fan_in)
        w = jax.random.uniform(kw, (fan_in, fan_out), jnp.float32, -bound, bound)
        b = jax.random.uniform(kb, (1, fan_out), jnp.float32, -bound, bound)
        params += [w, b]
    return tuple(params)


def _prepare_params(params):
    """Cast matmul operands to bf16 (biases stay f32); lane-pad only layer 3."""
    w1, b1, w2, b2, w3, b3 = params
    w1p = w1.astype(jnp.bfloat16)                                      # (784, 512)
    w2p = w2.astype(jnp.bfloat16)                                      # (512, 256)
    w3p = jnp.pad(w3, ((0, 0), (0, OUT_PAD - w3.shape[1]))).astype(jnp.bfloat16)
    b3p = jnp.pad(b3, ((0, 0), (0, OUT_PAD - b3.shape[1])))            # (1, 128) f32
    return w1p, b1, w2p, b2, w3p, b3p


@functools.partial(jax.jit, static_argnames=("tile_b",))
def discriminator_forward(img, params, tile_b=512):
    """img: (B, 1, 28, 28) float32 -> validity: (B, 1) float32."""
    B = img.shape[0]
    x = img.reshape(B, -1).astype(jnp.float32)                 # (B, 784)

    # Batch tile: multiple of 16 (bf16 sublane packing after in-kernel cast),
    # capped at tile_b. For typical GAN batch sizes (multiples of 16) no
    # padding pass over x is needed at all.
    TB = min(tile_b, _round_up(B, 16))
    B_pad = _round_up(B, TB)
    if B_pad != B:
        x = jnp.pad(x, ((0, B_pad - B), (0, 0)))

    w1, b1, w2, b2, w3, b3 = _prepare_params(params)

    out = pl.pallas_call(
        discriminator_kernel,
        out_shape=jax.ShapeDtypeStruct((B_pad, OUT_PAD), jnp.float32),
        grid=(B_pad // TB,),
        in_specs=[
            pl.BlockSpec((TB, IN_FEATURES), lambda i: (i, 0)),  # x: tiled over batch
            pl.BlockSpec((IN_FEATURES, H1), lambda i: (0, 0)),  # weights/biases resident
            pl.BlockSpec((1, H1), lambda i: (0, 0)),
            pl.BlockSpec((H1, H2), lambda i: (0, 0)),
            pl.BlockSpec((1, H2), lambda i: (0, 0)),
            pl.BlockSpec((H2, OUT_PAD), lambda i: (0, 0)),
            pl.BlockSpec((1, OUT_PAD), lambda i: (0, 0)),
        ],
        out_specs=pl.BlockSpec((TB, OUT_PAD), lambda i: (i, 0)),
        compiler_params=pltpu.CompilerParams(
            dimension_semantics=("parallel",),        # megacore split on v7x
            vmem_limit_bytes=32 * 1024 * 1024,        # ~6 MiB actually used
        ),
    )(x, w1, b1, w2, b2, w3, b3)

    return out[:B, :1]


def _reference_forward(img, params):
    """Pure-JAX f32 reference for correctness checking."""
    w1, b1, w2, b2, w3, b3 = params
    x = img.reshape(img.shape[0], -1).astype(jnp.float32)
    h = jax.nn.leaky_relu(x @ w1 + b1, negative_slope=0.2)
    h = jax.nn.leaky_relu(h @ w2 + b2, negative_slope=0.2)
    return jax.nn.sigmoid(h @ w3 + b3)


if __name__ == "__main__":
    key = jax.random.PRNGKey(0)
    k_params, k_img = jax.random.split(key)

    params = init_discriminator_params(k_params)

    # Small batch of MNIST-shaped images (B, C=1, 28, 28), NCHW like PyTorch.
    B = 2
    img = jax.random.normal(k_img, (B, 1, 28, 28), dtype=jnp.float32)

    validity = discriminator_forward(img, params)
    validity = jax.block_until_ready(validity)

    ref = _reference_forward(img, params)
    assert validity.shape == (B, 1)
    # bf16 matmul operands + approx reciprocal => loosened tolerance vs f32 ref.
    assert jnp.allclose(validity, ref, atol=2e-2, rtol=2e-2), (
        float(jnp.max(jnp.abs(validity - ref))))

    print("KERNEL_OK")
</pallas_src>

<mosaic_0001>
module attributes {stable_mosaic.version = 11 : i64} {
  func.func @discriminator_kernel(%arg0: i32, %arg1: memref<16x784xf32, #tpu.memory_space<vmem>>, %arg2: memref<784x512xbf16, #tpu.memory_space<vmem>>, %arg3: memref<1x512xf32, #tpu.memory_space<vmem>>, %arg4: memref<512x256xbf16, #tpu.memory_space<vmem>>, %arg5: memref<1x256xf32, #tpu.memory_space<vmem>>, %arg6: memref<256x128xbf16, #tpu.memory_space<vmem>>, %arg7: memref<1x128xf32, #tpu.memory_space<vmem>>, %arg8: memref<16x128xf32, #tpu.memory_space<vmem>>) attributes {dimension_semantics = [#tpu.dimension_semantics<parallel>], iteration_bounds = array<i64: 1>, scalar_prefetch = 0 : i64, scratch_operands = 0 : i64, tpu.core_type = #tpu.core_type<tc>, window_params = [{transform_indices = @transform_0, window_bounds = array<i64: 16, 784>}, {pipeline_mode = #tpu.pipeline_mode<synchronous>, transform_indices = @transform_1, window_bounds = array<i64: 784, 512>}, {pipeline_mode = #tpu.pipeline_mode<synchronous>, transform_indices = @transform_2, window_bounds = array<i64: 1, 512>}, {pipeline_mode = #tpu.pipeline_mode<synchronous>, transform_indices = @transform_3, window_bounds = array<i64: 512, 256>}, {pipeline_mode = #tpu.pipeline_mode<synchronous>, transform_indices = @transform_4, window_bounds = array<i64: 1, 256>}, {pipeline_mode = #tpu.pipeline_mode<synchronous>, transform_indices = @transform_5, window_bounds = array<i64: 256, 128>}, {pipeline_mode = #tpu.pipeline_mode<synchronous>, transform_indices = @transform_6, window_bounds = array<i64: 1, 128>}, {transform_indices = @transform_7, window_bounds = array<i64: 16, 128>}]} {
    %c0 = arith.constant 0 : index
    %c0_0 = arith.constant 0 : index
    %0 = vector.load %arg1[%c0, %c0_0] : memref<16x784xf32, #tpu.memory_space<vmem>>, vector<16x784xf32>
    %1 = arith.truncf %0 : vector<16x784xf32> to vector<16x784xbf16>
    %c0_1 = arith.constant 0 : index
    %c0_2 = arith.constant 0 : index
    %2 = vector.load %arg2[%c0_1, %c0_2] : memref<784x512xbf16, #tpu.memory_space<vmem>>, vector<784x512xbf16>
    %cst = arith.constant dense<0.000000e+00> : vector<16x512xf32>
    %3 = tpu.matmul %1, %2, %cst {dimension_numbers = #tpu.dot_dimension_numbers<[1], [0], [0], [1], [0, 0, 1, 1], [], []>} : vector<16x784xbf16>, vector<784x512xbf16>, vector<16x512xf32> -> vector<16x512xf32>
    %c0_3 = arith.constant 0 : index
    %c0_4 = arith.constant 0 : index
    %4 = vector.load %arg3[%c0_3, %c0_4] : memref<1x512xf32, #tpu.memory_space<vmem>>, vector<1x512xf32>
    %5 = vector.broadcast %4 : vector<1x512xf32> to vector<16x512xf32>
    %6 = arith.addf %3, %5 : vector<16x512xf32>
    %cst_5 = arith.constant 2.000000e-01 : f32
    %7 = vector.broadcast %cst_5 : f32 to vector<16x512xf32>
    %8 = arith.mulf %7, %6 : vector<16x512xf32>
    %9 = arith.maximumf %6, %8 : vector<16x512xf32>
    %10 = arith.truncf %9 : vector<16x512xf32> to vector<16x512xbf16>
    %c0_6 = arith.constant 0 : index
    %c0_7 = arith.constant 0 : index
    %11 = vector.load %arg4[%c0_6, %c0_7] : memref<512x256xbf16, #tpu.memory_space<vmem>>, vector<512x256xbf16>
    %cst_8 = arith.constant dense<0.000000e+00> : vector<16x256xf32>
    %12 = tpu.matmul %10, %11, %cst_8 {dimension_numbers = #tpu.dot_dimension_numbers<[1], [0], [0], [1], [0, 0, 1, 1], [], []>} : vector<16x512xbf16>, vector<512x256xbf16>, vector<16x256xf32> -> vector<16x256xf32>
    %c0_9 = arith.constant 0 : index
    %c0_10 = arith.constant 0 : index
    %13 = vector.load %arg5[%c0_9, %c0_10] : memref<1x256xf32, #tpu.memory_space<vmem>>, vector<1x256xf32>
    %14 = vector.broadcast %13 : vector<1x256xf32> to vector<16x256xf32>
    %15 = arith.addf %12, %14 : vector<16x256xf32>
    %cst_11 = arith.constant 2.000000e-01 : f32
    %16 = vector.broadcast %cst_11 : f32 to vector<16x256xf32>
    %17 = arith.mulf %16, %15 : vector<16x256xf32>
    %18 = arith.maximumf %15, %17 : vector<16x256xf32>
    %19 = arith.truncf %18 : vector<16x256xf32> to vector<16x256xbf16>
    %c0_12 = arith.constant 0 : index
    %c0_13 = arith.constant 0 : index
    %20 = vector.load %arg6[%c0_12, %c0_13] : memref<256x128xbf16, #tpu.memory_space<vmem>>, vector<256x128xbf16>
    %cst_14 = arith.constant dense<0.000000e+00> : vector<16x128xf32>
    %21 = tpu.matmul %19, %20, %cst_14 {dimension_numbers = #tpu.dot_dimension_numbers<[1], [0], [0], [1], [0, 0, 1, 1], [], []>} : vector<16x256xbf16>, vector<256x128xbf16>, vector<16x128xf32> -> vector<16x128xf32>
    %c0_15 = arith.constant 0 : index
    %c0_16 = arith.constant 0 : index
    %22 = vector.load %arg7[%c0_15, %c0_16] : memref<1x128xf32, #tpu.memory_space<vmem>>, vector<1x128xf32>
    %23 = vector.broadcast %22 : vector<1x128xf32> to vector<16x128xf32>
    %24 = arith.addf %21, %23 : vector<16x128xf32>
    %cst_17 = arith.constant 0.000000e+00 : f32
    %25 = vector.broadcast %cst_17 : f32 to vector<16x128xf32>
    %26 = arith.subf %25, %24 : vector<16x128xf32>
    %27 = math.exp %26 : vector<16x128xf32>
    %cst_18 = arith.constant 1.000000e+00 : f32
    %28 = vector.broadcast %cst_18 : f32 to vector<16x128xf32>
    %29 = arith.addf %28, %27 : vector<16x128xf32>
    %30 = tpu.reciprocal %29 {approx = true} : vector<16x128xf32> -> vector<16x128xf32>
    %c0_19 = arith.constant 0 : index
    %c0_20 = arith.constant 0 : index
    %31 = vector.load %arg8[%c0_19, %c0_20] : memref<16x128xf32, #tpu.memory_space<vmem>>, vector<16x128xf32>
    tpu.vector_store %arg8[%c0_19, %c0_20], %30 {strides = array<i32>} : memref<16x128xf32, #tpu.memory_space<vmem>>, vector<16x128xf32>,
    return
  }
  func.func @transform_0(%arg0: i32) -> (i32, i32) {
    %c0_i32 = arith.constant 0 : i32
    %c0_i32_0 = arith.constant 0 : i32
    return %arg0, %c0_i32 : i32, i32
  }
  func.func @transform_1(%arg0: i32) -> (i32, i32) {
    %c0_i32 = arith.constant 0 : i32
    %c0_i32_0 = arith.constant 0 : i32
    %c0_i32_1 = arith.constant 0 : i32
    return %c0_i32, %c0_i32_0 : i32, i32
  }
  func.func @transform_2(%arg0: i32) -> (i32, i32) {
    %c0_i32 = arith.constant 0 : i32
    %c0_i32_0 = arith.constant 0 : i32
    %c0_i32_1 = arith.constant 0 : i32
    return %c0_i32, %c0_i32_0 : i32, i32
  }
  func.func @transform_3(%arg0: i32) -> (i32, i32) {
    %c0_i32 = arith.constant 0 : i32
    %c0_i32_0 = arith.constant 0 : i32
    %c0_i32_1 = arith.constant 0 : i32
    return %c0_i32, %c0_i32_0 : i32, i32
  }
  func.func @transform_4(%arg0: i32) -> (i32, i32) {
    %c0_i32 = arith.constant 0 : i32
    %c0_i32_0 = arith.constant 0 : i32
    %c0_i32_1 = arith.constant 0 : i32
    return %c0_i32, %c0_i32_0 : i32, i32
  }
  func.func @transform_5(%arg0: i32) -> (i32, i32) {
    %c0_i32 = arith.constant 0 : i32
    %c0_i32_0 = arith.constant 0 : i32
    %c0_i32_1 = arith.constant 0 : i32
    return %c0_i32, %c0_i32_0 : i32, i32
  }
  func.func @transform_6(%arg0: i32) -> (i32, i32) {
    %c0_i32 = arith.constant 0 : i32
    %c0_i32_0 = arith.constant 0 : i32
    %c0_i32_1 = arith.constant 0 : i32
    return %c0_i32, %c0_i32_0 : i32, i32
  }
  func.func @transform_7(%arg0: i32) -> (i32, i32) {
    %c0_i32 = arith.constant 0 : i32
    %c0_i32_0 = arith.constant 0 : i32
    return %arg0, %c0_i32 : i32, i32
  }
}

</mosaic_0001>

<bundles_post_ra>
// kernel: discriminator_forward.1
= control target key start
LH: loop header
LB: loop body
LE: loop exit
PB: predicated region body
PF: predicated region fallthrough
CT: control target
= control target key end

     0   :  { %vm1234_vm0 = vcmask 130048   ;;  %s5496_s1 = inlined_call_operand.vmem [shape: bf16[784,512], index: 1, kind: input, shape index: {}]   ;;  %s5497_s0 = inlined_call_operand.vmem [shape: f32[16,784], index: 0, kind: input, shape index: {}]   ;;  %s5498_s2 = inlined_call_operand.vmem [shape: f32[1,512], index: 2, kind: input, shape index: {}]   ;;  %s5499_s3 = inlined_call_operand.vmem [shape: bf16[512,256], index: 3, kind: input, shape index: {}]   ;;  %s5500_s6 = inlined_call_operand.vmem [shape: f32[1,128], index: 6, kind: input, shape index: {}]   ;;  %s5501_s5 = inlined_call_operand.vmem [shape: bf16[256,128], index: 5, kind: input, shape index: {}]   ;;  %s5502_s4 = inlined_call_operand.vmem [shape: f32[1,256], index: 4, kind: input, shape index: {}]   ;;  %s5503_s7 = inlined_call_operand.vmem [shape: f32[16,128], index: 7, kind: output, shape index: {}]  }
   0x1   :  { %v2452_v0 = vld [vmem:[%s5496_s1 + $0xe0] sm:$0xf]  ;;  %v3476_v1 = vld [vmem:[%s5496_s1 + $0xec] sm:$0xf0] }
   0x2   :  { %v2580_v2 = vld [vmem:[%s5496_s1 + $0x1e0] sm:$0xf]  ;;  %v2453_v3 = vor.u32 %v3476_v1, %v2452_v0  ;;  %v3508_v4 = vld [vmem:[%s5496_s1 + $0x1ec] sm:$0xf0] }
   0x3   :  { %v2708_v5 = vld [vmem:[%s5496_s1 + $0x2e0] sm:$0xf]  ;;  %v3540_v6 = vld [vmem:[%s5496_s1 + $0x2ec] sm:$0xf0]  ;;  %v2581_v7 = vor.u32 %v3508_v4, %v2580_v2 }
   0x4   :  { %v2709_v8 = vor.u32 %v3540_v6, %v2708_v5  ;;  %v2836_v9 = vld [vmem:[%s5496_s1 + $0x3e0] sm:$0xf]  ;;  %v3572_v10 = vld [vmem:[%s5496_s1 + $0x3ec] sm:$0xf0]  ;;  %1238 = vmatpush.bf16.msra.mxu0 %v2453_v3 }
   0x5   :  { %v2436_v11 = vld [vmem:[%s5496_s1 + $0xc0] sm:$0xf]  ;;  %v2837_v12 = vor.u32 %v3572_v10, %v2836_v9  ;;  %v3472_v13 = vld [vmem:[%s5496_s1 + $0xcc] sm:$0xf0]  ;;  %1252 = vmatpush.bf16.msra.mxu1 %v2581_v7 }
   0x6   :  { %v2564_v14 = vld [vmem:[%s5496_s1 + $0x1c0] sm:$0xf]  ;;  %v3504_v15 = vld [vmem:[%s5496_s1 + $0x1cc] sm:$0xf0]  ;;  %1266 = vmatpush.bf16.msra.mxu2 %v2709_v8  ;;  %v2437_v16 = vor.u32 %v3472_v13, %v2436_v11 }
   0x7   :  { %v2565_v17 = vor.u32 %v3504_v15, %v2564_v14  ;;  %v2692_v18 = vld [vmem:[%s5496_s1 + $0x2c0] sm:$0xf]  ;;  %v3536_v19 = vld [vmem:[%s5496_s1 + $0x2cc] sm:$0xf0]  ;;  %1280 = vmatpush.bf16.msra.mxu3 %v2837_v12 }
   0x8   :  { %v2820_v20 = vld [vmem:[%s5496_s1 + $0x3c0] sm:$0xf]  ;;  %v2693_v21 = vor.u32 %v3536_v19, %v2692_v18  ;;  %v3568_v22 = vld [vmem:[%s5496_s1 + $0x3cc] sm:$0xf0]  ;;  %1239 = vmatpush.bf16.msra.mxu0 %v2437_v16 }
   0x9   :  { %v2420_v23 = vld [vmem:[%s5496_s1 + $0xa0] sm:$0xf]  ;;  %v3468_v24 = vld [vmem:[%s5496_s1 + $0xac] sm:$0xf0]  ;;  %v2821_v25 = vor.u32 %v3568_v22, %v2820_v20  ;;  %1253 = vmatpush.bf16.msra.mxu1 %v2565_v17 }
   0xa   :  { %v2548_v26 = vld [vmem:[%s5496_s1 + $0x1a0] sm:$0xf]  ;;  %v3500_v27 = vld [vmem:[%s5496_s1 + $0x1ac] sm:$0xf0]  ;;  %v2421_v29 = vor.u32 %v3468_v24, %v2420_v23  ;;  %1267 = vmatpush.bf16.msra.mxu2 %v2693_v21 }
   0xb   :  { %v2676_v28 = vld [vmem:[%s5496_s1 + $0x2a0] sm:$0xf]  ;;  %v3532_v30 = vld [vmem:[%s5496_s1 + $0x2ac] sm:$0xf0]  ;;  %v2549_v33 = vor.u32 %v3500_v27, %v2548_v26  ;;  %1281 = vmatpush.bf16.msra.mxu3 %v2821_v25 }
   0xc   :  { %v2804_v31 = vld [vmem:[%s5496_s1 + $0x3a0] sm:$0xf]  ;;  %v3564_v32 = vld [vmem:[%s5496_s1 + $0x3ac] sm:$0xf0]  ;;  %v2677_v34 = vor.u32 %v3532_v30, %v2676_v28  ;;  %1240 = vmatpush.bf16.msra.mxu0 %v2421_v29 }
   0xd   :  { %v2404_v35 = vld [vmem:[%s5496_s1 + $0x80] sm:$0xf]  ;;  %v3464_v36 = vld [vmem:[%s5496_s1 + $0x8c] sm:$0xf0]  ;;  %v2805_v38 = vor.u32 %v3564_v32, %v2804_v31  ;;  %1254 = vmatpush.bf16.msra.mxu1 %v2549_v33  ;;  %v3474_v32 = vld [vmem:[%s5496_s1 + $0xe4] sm:$0xf] }
   0xe   :  { %v2532_v37 = vld [vmem:[%s5496_s1 + $0x180] sm:$0xf]  ;;  %v3496_v39 = vld [vmem:[%s5496_s1 + $0x18c] sm:$0xf0]  ;;  %v2405_v44 = vor.u32 %v3464_v36, %v2404_v35  ;;  %1268 = vmatpush.bf16.msra.mxu2 %v2677_v34  ;;  %v2454_v33 = vld [vmem:[%s5496_s1 + $0xf0] sm:$0xf0] }
   0xf   :  { %v2660_v40 = vld [vmem:[%s5496_s1 + $0x280] sm:$0xf]  ;;  %v3528_v41 = vld [vmem:[%s5496_s1 + $0x28c] sm:$0xf0]  ;;  %v2533_v45 = vor.u32 %v3496_v39, %v2532_v37  ;;  %1282 = vmatpush.bf16.msra.mxu3 %v2805_v38  ;;  %v36_v36 = vld [vmem:[%s5497_s0 + $0x48] sm:$0xff] }
  0x10   :  { %v2788_v42 = vld [vmem:[%s5496_s1 + $0x380] sm:$0xf]  ;;  %v3560_v43 = vld [vmem:[%s5496_s1 + $0x38c] sm:$0xf0]  ;;  %v2661_v46 = vor.u32 %v3528_v41, %v2660_v40  ;;  %1241 = vmatpush.bf16.msra.mxu0 %v2405_v44  ;;  %v3506_v41 = vld [vmem:[%s5496_s1 + $0x1e4] sm:$0xf] }
  0x11   :  { %v2388_v47 = vld [vmem:[%s5496_s1 + $0x60] sm:$0xf]  ;;  %v3460_v48 = vld [vmem:[%s5496_s1 + $0x6c] sm:$0xf0]  ;;  %v2789_v50 = vor.u32 %v3560_v43, %v2788_v42  ;;  %1255 = vmatpush.bf16.msra.mxu1 %v2533_v45  ;;  %v34_v43 = vld [vmem:[%s5497_s0 + $0x38] sm:$0xff] }
  0x12   :  { %v2516_v49 = vld [vmem:[%s5496_s1 + $0x160] sm:$0xf]  ;;  %v3492_v51 = vld [vmem:[%s5496_s1 + $0x16c] sm:$0xf0]  ;;  %v2389_v56 = vor.u32 %v3460_v48, %v2388_v47  ;;  %1269 = vmatpush.bf16.msra.mxu2 %v2661_v46  ;;  %v2582_v46 = vld [vmem:[%s5496_s1 + $0x1f0] sm:$0xf0] }
  0x13   :  { %v2644_v52 = vld [vmem:[%s5496_s1 + $0x260] sm:$0xf]  ;;  %v3524_v53 = vld [vmem:[%s5496_s1 + $0x26c] sm:$0xf0]  ;;  %v2517_v57 = vor.u32 %v3492_v51, %v2516_v49  ;;  %1283 = vmatpush.bf16.msra.mxu3 %v2789_v50  ;;  %v30_v47 = vld [vmem:[%s5497_s0 + $0x18] sm:$0xff]  ;;  %v2457_v50 = vor.u32 %v3474_v32, %v2454_v33 }
  0x14   :  { %v2772_v54 = vld [vmem:[%s5496_s1 + $0x360] sm:$0xf]  ;;  %v3556_v55 = vld [vmem:[%s5496_s1 + $0x36c] sm:$0xf0]  ;;  %v2645_v58 = vor.u32 %v3524_v53, %v2644_v52  ;;  %1242 = vmatpush.bf16.msra.mxu0 %v2389_v56 }
  0x15   :  { %v2372_v59 = vld [vmem:[%s5496_s1 + $0x40] sm:$0xf]  ;;  %v3456_v60 = vld [vmem:[%s5496_s1 + $0x4c] sm:$0xf0]  ;;  %v2773_v62 = vor.u32 %v3556_v55, %v2772_v54  ;;  %1256 = vmatpush.bf16.msra.mxu1 %v2517_v57  ;;  %v3470_v57 = vld [vmem:[%s5496_s1 + $0xc4] sm:$0xf] }
  0x16   :  { %v2500_v61 = vld [vmem:[%s5496_s1 + $0x140] sm:$0xf]  ;;  %v3488_v63 = vld [vmem:[%s5496_s1 + $0x14c] sm:$0xf0]  ;;  %v2373_v4 = vor.u32 %v3456_v60, %v2372_v59  ;;  %1270 = vmatpush.bf16.msra.mxu2 %v2645_v58  ;;  %v2438_v58 = vld [vmem:[%s5496_s1 + $0xd0] sm:$0xf0] }
  0x17   :  { %v2628_v0 = vld [vmem:[%s5496_s1 + $0x240] sm:$0xf]  ;;  %v3520_v1 = vld [vmem:[%s5496_s1 + $0x24c] sm:$0xf0]  ;;  %v2501_v6 = vor.u32 %v3488_v63, %v2500_v61  ;;  %1284 = vmatpush.bf16.msra.mxu3 %v2773_v62  ;;  %v28_v61 = vld [vmem:[%s5497_s0 + $0x8] sm:$0xff]  ;;  %v2585_v63 = vor.u32 %v3506_v41, %v2582_v46 }
  0x18   :  { %v2756_v2 = vld [vmem:[%s5496_s1 + $0x340] sm:$0xf]  ;;  %v3552_v3 = vld [vmem:[%s5496_s1 + $0x34c] sm:$0xf0]  ;;  %v2629_v7 = vor.u32 %v3520_v1, %v2628_v0  ;;  %1243 = vmatpush.bf16.msra.mxu0 %v2373_v4  ;;  %v3502_v1 = vld [vmem:[%s5496_s1 + $0x1c4] sm:$0xf]  ;;  %v2441_v4 = vor.u32 %v3470_v57, %v2438_v58 }
  0x19   :  { %v2356_v5 = vld [vmem:[%s5496_s1 + $0x20] sm:$0xf]  ;;  %v3452_v8 = vld [vmem:[%s5496_s1 + $0x2c] sm:$0xf0]  ;;  %v2757_v11 = vor.u32 %v3552_v3, %v2756_v2  ;;  %1257 = vmatpush.bf16.msra.mxu1 %v2501_v6  ;;  %v2566_v2 = vld [vmem:[%s5496_s1 + $0x1d0] sm:$0xf0] }
  0x1a   :  { %v2484_v9 = vld [vmem:[%s5496_s1 + $0x120] sm:$0xf]  ;;  %v3484_v10 = vld [vmem:[%s5496_s1 + $0x12c] sm:$0xf0]  ;;  %v2357_v18 = vor.u32 %v3452_v8, %v2356_v5  ;;  %1271 = vmatpush.bf16.msra.mxu2 %v2629_v7  ;;  %v2518_v41 = vld [vmem:[%s5496_s1 + $0x170] sm:$0xf0] }
  0x1b   :  { %v2612_v12 = vld [vmem:[%s5496_s1 + $0x220] sm:$0xf]  ;;  %v3516_v13 = vld [vmem:[%s5496_s1 + $0x22c] sm:$0xf0]  ;;  %v2485_v23 = vor.u32 %v3484_v10, %v2484_v9  ;;  %1285 = vmatpush.bf16.msra.mxu3 %v2757_v11  ;;  %v3466_v10 = vld [vmem:[%s5496_s1 + $0xa4] sm:$0xf] }
  0x1c   :  { %v2740_v14 = vld [vmem:[%s5496_s1 + $0x320] sm:$0xf]  ;;  %v3548_v15 = vld [vmem:[%s5496_s1 + $0x32c] sm:$0xf0]  ;;  %v2613_v24 = vor.u32 %v3516_v13, %v2612_v12  ;;  %1244 = vmatpush.bf16.msra.mxu0 %v2357_v18  ;;  %v2422_v11 = vld [vmem:[%s5496_s1 + $0xb0] sm:$0xf0]  ;;  %v2569_v12 = vor.u32 %v3502_v1, %v2566_v2 }
  0x1d   :  { %v2340_v16 = vld [vmem:[%s5496_s1] sm:$0xf]  ;;  %v3448_v17 = vld [vmem:[%s5496_s1 + $0xc] sm:$0xf0]  ;;  %v2741_v28 = vor.u32 %v3548_v15, %v2740_v14  ;;  %1258 = vmatpush.bf16.msra.mxu1 %v2485_v23  ;;  %v3498_v14 = vld [vmem:[%s5496_s1 + $0x1a4] sm:$0xf] }
  0x1e   :  { %v2468_v19 = vld [vmem:[%s5496_s1 + $0x100] sm:$0xf]  ;;  %v3480_v20 = vld [vmem:[%s5496_s1 + $0x10c] sm:$0xf0]  ;;  %v2341_v35 = vor.u32 %v3448_v17, %v2340_v16  ;;  %1272 = vmatpush.bf16.msra.mxu2 %v2613_v24  ;;  %v2550_v15 = vld [vmem:[%s5496_s1 + $0x1b0] sm:$0xf0]  ;;  %v2425_v17 = vor.u32 %v3466_v10, %v2422_v11 }
  0x1f   :  { %v2596_v21 = vld [vmem:[%s5496_s1 + $0x200] sm:$0xf]  ;;  %v3512_v22 = vld [vmem:[%s5496_s1 + $0x20c] sm:$0xf0]  ;;  %v2469_v39 = vor.u32 %v3480_v20, %v2468_v19  ;;  %1286 = vmatpush.bf16.msra.mxu3 %v2741_v28  ;;  %v2406_v23 = vld [vmem:[%s5496_s1 + $0x90] sm:$0xf0]  ;;  %v2553_v24 = vor.u32 %v3498_v14, %v2550_v15 }
  0x20   :  { %v2724_v25 = vld [vmem:[%s5496_s1 + $0x300] sm:$0xf]  ;;  %v3544_v26 = vld [vmem:[%s5496_s1 + $0x30c] sm:$0xf0]  ;;  %v2597_v40 = vor.u32 %v3512_v22, %v2596_v21  ;;  %1245 = vmatpush.bf16.msra.mxu0 %v2341_v35  ;;  %v3462_v22 = vld [vmem:[%s5496_s1 + $0x84] sm:$0xf] }
  0x21   :  { %v2964_v27 = vld [vmem:[%s5496_s1 + $0x4e0] sm:$0xf]  ;;  %v3604_v29 = vld [vmem:[%s5496_s1 + $0x4ec] sm:$0xf0]  ;;  %v2725_v44 = vor.u32 %v3544_v26, %v2724_v25  ;;  %1259 = vmatpush.bf16.msra.mxu1 %v2469_v39  ;;  %v3494_v26 = vld [vmem:[%s5496_s1 + $0x184] sm:$0xf] }
  0x22   :  { %v3092_v30 = vld [vmem:[%s5496_s1 + $0x5e0] sm:$0xf]  ;;  %v3636_v31 = vld [vmem:[%s5496_s1 + $0x5ec] sm:$0xf0]  ;;  %v2965_v45 = vor.u32 %v3604_v29, %v2964_v27  ;;  %1273 = vmatpush.bf16.msra.mxu2 %v2597_v40  ;;  %v2534_v27 = vld [vmem:[%s5496_s1 + $0x190] sm:$0xf0]  ;;  %v2409_v29 = vor.u32 %v3462_v22, %v2406_v23 }
  0x23   :  { %v29_v34 = vld [vmem:[%s5497_s0 + $0x10] sm:$0xff]  ;;  %v3108_v37 = vld [vmem:[%s5496_s1 + $0x600] sm:$0xf]  ;;  %v3093_v49 = vor.u32 %v3636_v31, %v3092_v30  ;;  %1287 = vmatpush.bf16.msra.mxu3 %v2725_v44  ;;  %v3490_v40 = vld [vmem:[%s5496_s1 + $0x164] sm:$0xf] }
  0x24   :  { %v3640_v38 = vld [vmem:[%s5496_s1 + $0x60c] sm:$0xf0]  ;;  %v27_v42 = vld [vmem:[%s5497_s0] sm:$0xff]  ;;  %v4020_v54 = vpack.c.bf16 %v36_v36, %v29_v34  ;;  %1294 = vmatpush.bf16.msrb.mxu0 %v2965_v45  ;;  %v2390_v35 = vld [vmem:[%s5496_s1 + $0x70] sm:$0xf0] }
  0x25   :  { %v37_v48 = vld [vmem:[%s5497_s0 + $0x50] sm:$0xff]  ;;  %v2948_v51 = vld [vmem:[%s5496_s1 + $0x4c0] sm:$0xf]  ;;  %v4022_v55 = vpack.c.bf16 %v34_v43, %v27_v42  ;;  %v3109_v59 = vor.u32 %v3640_v38, %v3108_v37  ;;  %1308 = vmatpush.bf16.msrb.mxu1 %v3093_v49  ;;  %v3458_v34 = vld [vmem:[%s5496_s1 + $0x64] sm:$0xf]  ;;  %v2537_v38 = vor.u32 %v3494_v26, %v2534_v27 }
  0x26   :  { %v3600_v52 = vld [vmem:[%s5496_s1 + $0x4cc] sm:$0xf0]  ;;  %v3076_v53 = vld [vmem:[%s5496_s1 + $0x5c0] sm:$0xf]  ;;  %v4033_v60 = vpack.c.bf16 %v37_v48, %v30_v47  ;;  %1274 = vmatmul.bf16.vlgmr.msra.gmra.mxu2 %v4020_v54  ;;  %v40_v37 = vld [vmem:[%s5497_s0 + $0x68] sm:$0xff]  ;;  %v2393_v43 = vor.u32 %v3458_v34, %v2390_v35 }
  0x27   :  { %v3632_v56 = vld [vmem:[%s5496_s1 + $0x5cc] sm:$0xf0]  ;;  %v35_v62 = vld [vmem:[%s5497_s0 + $0x40] sm:$0xff]  ;;  %v2949_v0 = vor.u32 %v3600_v52, %v2948_v51  ;;  %1336 = vmatpush.bf16.msrb.mxu3 %v2457_v50  ;;  %1246 = vmatmul.bf16.vlgmr.msra.gmra.mxu0 %v4022_v55  ;;  %v2374_v49 = vld [vmem:[%s5496_s1 + $0x50] sm:$0xf0]  ;;  %v2521_v51 = vor.u32 %v3490_v40, %v2518_v41 }
  0x28   :  { %v3077_v3 = vor.u32 %v3632_v56, %v3076_v53  ;;  %v2932_v5 = vld [vmem:[%s5496_s1 + $0x4a0] sm:$0xf]  ;;  %v3596_v6 = vld [vmem:[%s5496_s1 + $0x4ac] sm:$0xf0]  ;;  %v4058_v8 = vpack.c.bf16 %v35_v62, %v28_v61  ;;  %1329 = vmatpush.bf16.msrb.mxu2 %v3109_v59  ;;  %1288 = vmatmul.bf16.vlgmr.msra.gmra.mxu3 %v4033_v60  ;;  %v3454_v48 = vld [vmem:[%s5496_s1 + $0x44] sm:$0xf] }
  0x29   :  { %v3060_v7 = vld [vmem:[%s5496_s1 + $0x5a0] sm:$0xf]  ;;  %v3628_v9 = vld [vmem:[%s5496_s1 + $0x5ac] sm:$0xf0]  ;;  %1295 = vmatpush.bf16.msrb.mxu0 %v2949_v0  ;;  %v2933_v13 = vor.u32 %v3596_v6, %v2932_v5  ;;  %v3486_v53 = vld [vmem:[%s5496_s1 + $0x144] sm:$0xf]  ;;  %v2377_v58 = vor.u32 %v3454_v48, %v2374_v49 }
  0x2a   :  { %1309 = vmatpush.bf16.msrb.mxu1 %v3077_v3  ;;  %v3061_v16 = vor.u32 %v3628_v9, %v3060_v7  ;;  %v2916_v18 = vld [vmem:[%s5496_s1 + $0x480] sm:$0xf]  ;;  %v3592_v19 = vld [vmem:[%s5496_s1 + $0x48c] sm:$0xf0]  ;;  %v2502_v56 = vld [vmem:[%s5496_s1 + $0x150] sm:$0xf0] }
  0x2b   :  { %1337 = vmatpush.bf16.msrb.mxu3 %v2441_v4  ;;  %v3044_v20 = vld [vmem:[%s5496_s1 + $0x580] sm:$0xf]  ;;  %1260 = vmatmul.bf16.vlgmr.msra.gmra.mxu1 %v4058_v8  ;;  %v3624_v21 = vld [vmem:[%s5496_s1 + $0x58c] sm:$0xf0]  ;;  %v2917_v25 = vor.u32 %v3592_v19, %v2916_v18  ;;  %v3450_v0 = vld [vmem:[%s5496_s1 + $0x24] sm:$0xf]  ;;  %v2505_v4 = vor.u32 %v3486_v53, %v2502_v56 }
  0x2c   :  { %1350 = vmatpush.bf16.msra.mxu2 %v2585_v63  ;;  %v3045_v28 = vor.u32 %v3624_v21, %v3044_v20  ;;  %v2900_v30 = vld [vmem:[%s5496_s1 + $0x460] sm:$0xf]  ;;  %v3588_v31 = vld [vmem:[%s5496_s1 + $0x46c] sm:$0xf0]  ;;  %v2358_v1 = vld [vmem:[%s5496_s1 + $0x30] sm:$0xf0] }
  0x2d   :  { %1296 = vmatpush.bf16.msrb.mxu0 %v2933_v13  ;;  %v3028_v32 = vld [vmem:[%s5496_s1 + $0x560] sm:$0xf]  ;;  %v3620_v33 = vld [vmem:[%s5496_s1 + $0x56c] sm:$0xf0]  ;;  %v2901_v39 = vor.u32 %v3588_v31, %v2900_v30  ;;  %v3482_v2 = vld [vmem:[%s5496_s1 + $0x124] sm:$0xf]  ;;  %v2361_v11 = vor.u32 %v3450_v0, %v2358_v1 }
  0x2e   :  { %1310 = vmatpush.bf16.msrb.mxu1 %v3061_v16  ;;  %v33_v36 = vld [vmem:[%s5497_s0 + $0x30] sm:$0xff]  ;;  %v3029_v42 = vor.u32 %v3620_v33, %v3028_v32  ;;  %v2884_v44 = vld [vmem:[%s5496_s1 + $0x440] sm:$0xf]  ;;  %v3446_v13 = vld [vmem:[%s5496_s1 + $0x4] sm:$0xf] }
  0x2f   :  { %1338 = vmatpush.bf16.msrb.mxu3 %v2425_v17  ;;  %v3584_v45 = vld [vmem:[%s5496_s1 + $0x44c] sm:$0xf0]  ;;  %v3012_v46 = vld [vmem:[%s5496_s1 + $0x540] sm:$0xf]  ;;  %v4149_v50 = vpack.c.bf16 %v40_v37, %v33_v36  ;;  %v2486_v3 = vld [vmem:[%s5496_s1 + $0x130] sm:$0xf0] }
  0x30   :  { %1351 = vmatpush.bf16.msra.mxu2 %v2569_v12  ;;  %v3616_v47 = vld [vmem:[%s5496_s1 + $0x54c] sm:$0xf0]  ;;  %v2885_v52 = vor.u32 %v3584_v45, %v2884_v44  ;;  %v2868_v59 = vld [vmem:[%s5496_s1 + $0x420] sm:$0xf]  ;;  %v2342_v14 = vld [vmem:[%s5496_s1 + $0x10] sm:$0xf0]  ;;  %v2489_v21 = vor.u32 %v3482_v2, %v2486_v3 }
  0x31   :  { %1297 = vmatpush.bf16.msrb.mxu0 %v2917_v25  ;;  %v3013_v57 = vor.u32 %v3616_v47, %v3012_v46  ;;  %v3580_v61 = vld [vmem:[%s5496_s1 + $0x42c] sm:$0xf0]  ;;  %v2996_v62 = vld [vmem:[%s5496_s1 + $0x520] sm:$0xf]  ;;  %v3538_v15 = vld [vmem:[%s5496_s1 + $0x2e4] sm:$0xf]  ;;  %v2345_v27 = vor.u32 %v3446_v13, %v2342_v14 }
  0x32   :  { %1311 = vmatpush.bf16.msrb.mxu1 %v3045_v28  ;;  %v3612_v63 = vld [vmem:[%s5496_s1 + $0x52c] sm:$0xf0]  ;;  %v2869_v5 = vor.u32 %v3580_v61, %v2868_v59  ;;  %v2852_v6 = vld [vmem:[%s5496_s1 + $0x400] sm:$0xf]  ;;  %v2710_v16 = vld [vmem:[%s5496_s1 + $0x2f0] sm:$0xf0] }
  0x33   :  { %1339 = vmatpush.bf16.msrb.mxu3 %v2409_v29  ;;  %v3576_v7 = vld [vmem:[%s5496_s1 + $0x40c] sm:$0xf0]  ;;  %v2980_v9 = vld [vmem:[%s5496_s1 + $0x500] sm:$0xf]  ;;  %v2997_v10 = vor.u32 %v3612_v63, %v2996_v62  ;;  %v3570_v17 = vld [vmem:[%s5496_s1 + $0x3e4] sm:$0xf]  ;;  %v2713_v31 = vor.u32 %v3538_v15, %v2710_v16 }
  0x34   :  { %1352 = vmatpush.bf16.msra.mxu2 %v2553_v24  ;;  %v3608_v12 = vld [vmem:[%s5496_s1 + $0x50c] sm:$0xf0]  ;;  %v2838_v18 = vld [vmem:[%s5496_s1 + $0x3f0] sm:$0xf0]  ;;  %v3602_v19 = vld [vmem:[%s5496_s1 + $0x4e4] sm:$0xf]  ;;  %v2853_v22 = vor.u32 %v3576_v7, %v2852_v6 }
  0x35   :  { %1298 = vmatpush.bf16.msrb.mxu0 %v2901_v39  ;;  %v2966_v20 = vld [vmem:[%s5496_s1 + $0x4f0] sm:$0xf0]  ;;  %v31_v23 = vld [vmem:[%s5497_s0 + $0x20] sm:$0xff]  ;;  %v38_v24 = vld [vmem:[%s5497_s0 + $0x58] sm:$0xff]  ;;  %v2981_v26 = vor.u32 %v3608_v12, %v2980_v9  ;;  %v2841_v32 = vor.u32 %v3570_v17, %v2838_v18 }
  0x36   :  { %1312 = vmatpush.bf16.msrb.mxu1 %v3029_v42  ;;  %3122 = vmatmul.msk.bf16.vlgmr.msrb.gmra.mxu2 %vm1234_vm0, %v4149_v50  ;;  %v3478_v25 = vld [vmem:[%s5496_s1 + $0x104] sm:$0xf]  ;;  %v2470_v28 = vld [vmem:[%s5496_s1 + $0x110] sm:$0xf0]  ;;  %v32_v29 = vld [vmem:[%s5497_s0 + $0x28] sm:$0xff]  ;;  %v2969_v36 = vor.u32 %v3602_v19, %v2966_v20  ;;  %v4246_v37 = vpack.c.bf16 %v38_v24, %v31_v23 }
  0x37   :  { %1340 = vmatpush.bf16.msrb.mxu3 %v2393_v43  ;;  %v39_v30 = vld [vmem:[%s5497_s0 + $0x60] sm:$0xff]  ;;  %v3094_v34 = vld [vmem:[%s5496_s1 + $0x5f0] sm:$0xf0]  ;;  %v2473_v41 = vor.u32 %v3478_v25, %v2470_v28 }
  0x38   :  { %1353 = vmatpush.bf16.msra.mxu2 %v2537_v38  ;;  %v3634_v33 = vld [vmem:[%s5496_s1 + $0x5e4] sm:$0xf]  ;;  %v2694_v38 = vld [vmem:[%s5496_s1 + $0x2d0] sm:$0xf0]  ;;  %v4257_v42 = vpack.c.bf16 %v39_v30, %v32_v29 }
  0x39   :  { %1299 = vmatpush.bf16.msrb.mxu0 %v2885_v52  ;;  %v3534_v35 = vld [vmem:[%s5496_s1 + $0x2c4] sm:$0xf]  ;;  %v2822_v40 = vld [vmem:[%s5496_s1 + $0x3d0] sm:$0xf0]  ;;  %v3097_v45 = vor.u32 %v3634_v33, %v3094_v34 }
  0x3a   :  { %1313 = vmatpush.bf16.msrb.mxu1 %v3013_v57  ;;  %v3566_v39 = vld [vmem:[%s5496_s1 + $0x3c4] sm:$0xf]  ;;  %v2950_v44 = vld [vmem:[%s5496_s1 + $0x4d0] sm:$0xf0]  ;;  %v2697_v46 = vor.u32 %v3534_v35, %v2694_v38 }
  0x3b   :  { %1341 = vmatpush.bf16.msrb.mxu3 %v2377_v58  ;;  %v3598_v43 = vld [vmem:[%s5496_s1 + $0x4c4] sm:$0xf]  ;;  %v2825_v47 = vor.u32 %v3566_v39, %v2822_v40  ;;  %v3078_v49 = vld [vmem:[%s5496_s1 + $0x5d0] sm:$0xf0] }
  0x3c   :  { %1354 = vmatpush.bf16.msra.mxu2 %v2521_v51  ;;  %v3630_v48 = vld [vmem:[%s5496_s1 + $0x5c4] sm:$0xf]  ;;  %v2953_v52 = vor.u32 %v3598_v43, %v2950_v44  ;;  %v2678_v53 = vld [vmem:[%s5496_s1 + $0x2b0] sm:$0xf0] }
  0x3d   :  { %1300 = vmatpush.bf16.msrb.mxu0 %v2869_v5  ;;  %v3530_v51 = vld [vmem:[%s5496_s1 + $0x2a4] sm:$0xf]  ;;  %v2806_v57 = vld [vmem:[%s5496_s1 + $0x3b0] sm:$0xf0]  ;;  %v3081_v61 = vor.u32 %v3630_v48, %v3078_v49 }
  0x3e   :  { %1314 = vmatpush.bf16.msrb.mxu1 %v2997_v10  ;;  %v3562_v56 = vld [vmem:[%s5496_s1 + $0x3a4] sm:$0xf]  ;;  %v2934_v59 = vld [vmem:[%s5496_s1 + $0x4b0] sm:$0xf0]  ;;  %v2681_v62 = vor.u32 %v3530_v51, %v2678_v53 }
  0x3f   :  { %1342 = vmatpush.bf16.msrb.mxu3 %v2361_v11  ;;  %v3594_v58 = vld [vmem:[%s5496_s1 + $0x4a4] sm:$0xf]  ;;  %v2809_v63 = vor.u32 %v3562_v56, %v2806_v57  ;;  %v3062_v1 = vld [vmem:[%s5496_s1 + $0x5b0] sm:$0xf0] }
  0x40   :  { %1355 = vmatpush.bf16.msra.mxu2 %v2505_v4  ;;  %v3626_v0 = vld [vmem:[%s5496_s1 + $0x5a4] sm:$0xf]  ;;  %v2937_v3 = vor.u32 %v3594_v58, %v2934_v59  ;;  %v2662_v4 = vld [vmem:[%s5496_s1 + $0x290] sm:$0xf0] }
  0x41   :  { %1301 = vmatpush.bf16.msrb.mxu0 %v2853_v22  ;;  %v3526_v2 = vld [vmem:[%s5496_s1 + $0x284] sm:$0xf]  ;;  %v2790_v6 = vld [vmem:[%s5496_s1 + $0x390] sm:$0xf0]  ;;  %v3065_v10 = vor.u32 %v3626_v0, %v3062_v1  ;;  %v2460_v0 = vld [vmem:[%s5496_s1 + $0xe8] sm:$0xf] }
  0x42   :  { %1315 = vmatpush.bf16.msrb.mxu1 %v2981_v26  ;;  %v3558_v5 = vld [vmem:[%s5496_s1 + $0x384] sm:$0xf]  ;;  %v2918_v9 = vld [vmem:[%s5496_s1 + $0x490] sm:$0xf0]  ;;  %v2665_v11 = vor.u32 %v3526_v2, %v2662_v4  ;;  %v3477_v1 = vld [vmem:[%s5496_s1 + $0xf4] sm:$0xf0] }
  0x43   :  { %1343 = vmatpush.bf16.msrb.mxu3 %v2345_v27  ;;  %v3590_v7 = vld [vmem:[%s5496_s1 + $0x484] sm:$0xf]  ;;  %v2793_v12 = vor.u32 %v3558_v5, %v2790_v6  ;;  %v3046_v14 = vld [vmem:[%s5496_s1 + $0x590] sm:$0xf0]  ;;  %v2588_v2 = vld [vmem:[%s5496_s1 + $0x1e8] sm:$0xf] }
  0x44   :  { %1356 = vmatpush.bf16.msra.mxu2 %v2489_v21  ;;  %1302 = vmatmul.bf16.vlgmr.msrb.gmra.mxu0 %v4246_v37  ;;  %v3622_v13 = vld [vmem:[%s5496_s1 + $0x584] sm:$0xf]  ;;  %v2921_v16 = vor.u32 %v3590_v7, %v2918_v9  ;;  %v2646_v17 = vld [vmem:[%s5496_s1 + $0x270] sm:$0xf0]  ;;  %v3509_v4 = vld [vmem:[%s5496_s1 + $0x1f4] sm:$0xf0] }
  0x45   :  { %1364 = vmatpush.bf16.msra.mxu0 %v2713_v31  ;;  %1316 = vmatmul.bf16.vlgmr.msrb.gmra.mxu1 %v4257_v42  ;;  %v3522_v15 = vld [vmem:[%s5496_s1 + $0x264] sm:$0xf]  ;;  %v2774_v19 = vld [vmem:[%s5496_s1 + $0x370] sm:$0xf0]  ;;  %v3049_v22 = vor.u32 %v3622_v13, %v3046_v14  ;;  %v2461_v13 = vor.u32 %v3477_v1, %v2460_v0  ;;  %v2844_v14 = vld [vmem:[%s5496_s1 + $0x3e8] sm:$0xf] }
  0x46   :  { %1378 = vmatpush.bf16.msra.mxu1 %v2841_v32  ;;  %1344 = vmatmul.bf16.vlgmr.msrb.gmra.mxu3 %v4022_v55  ;;  %v3554_v18 = vld [vmem:[%s5496_s1 + $0x364] sm:$0xf]  ;;  %v2902_v21 = vld [vmem:[%s5496_s1 + $0x470] sm:$0xf0]  ;;  %v2649_v23 = vor.u32 %v3522_v15, %v2646_v17  ;;  %v3573_v15 = vld [vmem:[%s5496_s1 + $0x3f4] sm:$0xf0]  ;;  %v2589_v17 = vor.u32 %v3509_v4, %v2588_v2 }
  0x47   :  { %1392 = vmatpush.bf16.msra.mxu3 %v2969_v36  ;;  %v3586_v20 = vld [vmem:[%s5496_s1 + $0x464] sm:$0xf]  ;;  %v2777_v24 = vor.u32 %v3554_v18, %v2774_v19  ;;  %v3030_v26 = vld [vmem:[%s5496_s1 + $0x570] sm:$0xf0]  ;;  %v3473_v18 = vld [vmem:[%s5496_s1 + $0xd4] sm:$0xf0] }
  0x48   :  { %1357 = vmatpush.bf16.msra.mxu2 %v2473_v41  ;;  %v3618_v25 = vld [vmem:[%s5496_s1 + $0x564] sm:$0xf]  ;;  %v2905_v28 = vor.u32 %v3586_v20, %v2902_v21  ;;  %v2630_v29 = vld [vmem:[%s5496_s1 + $0x250] sm:$0xf0]  ;;  %v2716_v20 = vld [vmem:[%s5496_s1 + $0x2e8] sm:$0xf] }
  0x49   :  { %1365 = vmatpush.bf16.msra.mxu0 %v2697_v46  ;;  %v3518_v27 = vld [vmem:[%s5496_s1 + $0x244] sm:$0xf]  ;;  %v2758_v31 = vld [vmem:[%s5496_s1 + $0x350] sm:$0xf0]  ;;  %v3033_v34 = vor.u32 %v3618_v25, %v3030_v26  ;;  %v3541_v21 = vld [vmem:[%s5496_s1 + $0x2f4] sm:$0xf0]  ;;  %v2845_v25 = vor.u32 %v3573_v15, %v2844_v14 }
  0x4a   :  { %1379 = vmatpush.bf16.msra.mxu1 %v2825_v47  ;;  %v3550_v30 = vld [vmem:[%s5496_s1 + $0x344] sm:$0xf]  ;;  %v2886_v33 = vld [vmem:[%s5496_s1 + $0x450] sm:$0xf0]  ;;  %v2633_v35 = vor.u32 %v3518_v27, %v2630_v29  ;;  %v2828_v27 = vld [vmem:[%s5496_s1 + $0x3c8] sm:$0xf] }
  0x4b   :  { %1393 = vmatpush.bf16.msra.mxu3 %v2953_v52  ;;  %1358 = vmatmul.bf16.vlgmr.msra.gmra.mxu2 %v4058_v8  ;;  %v3582_v32 = vld [vmem:[%s5496_s1 + $0x444] sm:$0xf]  ;;  %v2761_v36 = vor.u32 %v3550_v30, %v2758_v31  ;;  %v3014_v39 = vld [vmem:[%s5496_s1 + $0x550] sm:$0xf0]  ;;  %v2428_v29 = vld [vmem:[%s5496_s1 + $0xa8] sm:$0xf]  ;;  %v2717_v30 = vor.u32 %v3541_v21, %v2716_v20 }
  0x4c   :  { %1406 = vmatpush.bf16.msrb.mxu2 %v3097_v45  ;;  %v3614_v38 = vld [vmem:[%s5496_s1 + $0x544] sm:$0xf]  ;;  %v2889_v41 = vor.u32 %v3582_v32, %v2886_v33  ;;  %v2614_v43 = vld [vmem:[%s5496_s1 + $0x230] sm:$0xf0]  ;;  %v3469_v32 = vld [vmem:[%s5496_s1 + $0xb4] sm:$0xf0] }
  0x4d   :  { %1366 = vmatpush.bf16.msra.mxu0 %v2681_v62  ;;  %v3514_v40 = vld [vmem:[%s5496_s1 + $0x224] sm:$0xf]  ;;  %v2742_v45 = vld [vmem:[%s5496_s1 + $0x330] sm:$0xf0]  ;;  %v3017_v48 = vor.u32 %v3614_v38, %v3014_v39  ;;  %v2700_v33 = vld [vmem:[%s5496_s1 + $0x2c8] sm:$0xf]  ;;  %v2429_v39 = vor.u32 %v3469_v32, %v2428_v29 }
  0x4e   :  { %1380 = vmatpush.bf16.msra.mxu1 %v2809_v63  ;;  %v3546_v44 = vld [vmem:[%s5496_s1 + $0x324] sm:$0xf]  ;;  %v2870_v47 = vld [vmem:[%s5496_s1 + $0x430] sm:$0xf0]  ;;  %v2617_v52 = vor.u32 %v3514_v40, %v2614_v43  ;;  %v2812_v40 = vld [vmem:[%s5496_s1 + $0x3a8] sm:$0xf] }
  0x4f   :  { %1394 = vmatpush.bf16.msra.mxu3 %v2937_v3  ;;  %v3578_v46 = vld [vmem:[%s5496_s1 + $0x424] sm:$0xf]  ;;  %v2998_v51 = vld [vmem:[%s5496_s1 + $0x530] sm:$0xf0]  ;;  %v2745_v53 = vor.u32 %v3546_v44, %v2742_v45  ;;  %v2412_v43 = vld [vmem:[%s5496_s1 + $0x88] sm:$0xf] }
  0x50   :  { %1407 = vmatpush.bf16.msrb.mxu2 %v3081_v61  ;;  %v3610_v49 = vld [vmem:[%s5496_s1 + $0x524] sm:$0xf]  ;;  %v2598_v57 = vld [vmem:[%s5496_s1 + $0x210] sm:$0xf0]  ;;  %v2873_v59 = vor.u32 %v3578_v46, %v2870_v47  ;;  %v3465_v46 = vld [vmem:[%s5496_s1 + $0x94] sm:$0xf0] }
  0x51   :  { %1367 = vmatpush.bf16.msra.mxu0 %v2665_v11  ;;  %v3510_v56 = vld [vmem:[%s5496_s1 + $0x204] sm:$0xf]  ;;  %v2726_v61 = vld [vmem:[%s5496_s1 + $0x310] sm:$0xf0]  ;;  %v3001_v3 = vor.u32 %v3610_v49, %v2998_v51  ;;  %v2684_v47 = vld [vmem:[%s5496_s1 + $0x2a8] sm:$0xf] }
  0x52   :  { %1381 = vmatpush.bf16.msra.mxu1 %v2793_v12  ;;  %v3542_v58 = vld [vmem:[%s5496_s1 + $0x304] sm:$0xf]  ;;  %v2854_v63 = vld [vmem:[%s5496_s1 + $0x410] sm:$0xf0]  ;;  %v2601_v7 = vor.u32 %v3510_v56, %v2598_v57  ;;  %v2540_v49 = vld [vmem:[%s5496_s1 + $0x188] sm:$0xf] }
  0x53   :  { %1395 = vmatpush.bf16.msra.mxu3 %v2921_v16  ;;  %v3574_v62 = vld [vmem:[%s5496_s1 + $0x404] sm:$0xf]  ;;  %v3110_v6 = vld [vmem:[%s5496_s1 + $0x610] sm:$0xf0]  ;;  %v2729_v9 = vor.u32 %v3542_v58, %v2726_v61  ;;  %v2444_v16 = vld [vmem:[%s5496_s1 + $0xc8] sm:$0xf] }
  0x54   :  { %1408 = vmatpush.bf16.msrb.mxu2 %v3065_v10  ;;  %v3638_v5 = vld [vmem:[%s5496_s1 + $0x604] sm:$0xf]  ;;  %v2982_v11 = vld [vmem:[%s5496_s1 + $0x510] sm:$0xf0]  ;;  %v2857_v12 = vor.u32 %v3574_v62, %v2854_v63  ;;  %v2445_v26 = vor.u32 %v3473_v18, %v2444_v16  ;;  %v3497_v51 = vld [vmem:[%s5496_s1 + $0x194] sm:$0xf0] }
  0x55   :  { %1368 = vmatpush.bf16.msra.mxu0 %v2649_v23  ;;  %v3606_v10 = vld [vmem:[%s5496_s1 + $0x504] sm:$0xf]  ;;  %v3113_v19 = vor.u32 %v3638_v5, %v3110_v6  ;;  %v2572_v23 = vld [vmem:[%s5496_s1 + $0x1c8] sm:$0xf]  ;;  %v3561_v57 = vld [vmem:[%s5496_s1 + $0x394] sm:$0xf0]  ;;  %v2541_v61 = vor.u32 %v3497_v51, %v2540_v49 }
  0x56   :  { %1382 = vmatpush.bf16.msra.mxu1 %v2777_v24  ;;  %v3505_v24 = vld [vmem:[%s5496_s1 + $0x1d4] sm:$0xf0]  ;;  %v2796_v56 = vld [vmem:[%s5496_s1 + $0x388] sm:$0xf] }
  0x57   :  { %1396 = vmatpush.bf16.msra.mxu3 %v2905_v28  ;;  %v3569_v28 = vld [vmem:[%s5496_s1 + $0x3d4] sm:$0xf0]  ;;  %v2573_v31 = vor.u32 %v3505_v24, %v2572_v23  ;;  %v2396_v58 = vld [vmem:[%s5496_s1 + $0x68] sm:$0xf] }
  0x58   :  { %1409 = vmatpush.bf16.msrb.mxu2 %v3049_v22  ;;  %v2985_v22 = vor.u32 %v3606_v10, %v2982_v11  ;;  %v2829_v38 = vor.u32 %v3569_v28, %v2828_v27  ;;  %v3461_v62 = vld [vmem:[%s5496_s1 + $0x74] sm:$0xf0]  ;;  %v2668_v63 = vld [vmem:[%s5496_s1 + $0x288] sm:$0xf] }
  0x59   :  { %1369 = vmatpush.bf16.msra.mxu0 %v2633_v35  ;;  %v2556_v35 = vld [vmem:[%s5496_s1 + $0x1a8] sm:$0xf]  ;;  %v3529_v0 = vld [vmem:[%s5496_s1 + $0x294] sm:$0xf0]  ;;  %v2397_v4 = vor.u32 %v3461_v62, %v2396_v58 }
  0x5a   :  { %1383 = vmatpush.bf16.msra.mxu1 %v2761_v36  ;;  %v3501_v36 = vld [vmem:[%s5496_s1 + $0x1b4] sm:$0xf0]  ;;  %v2524_v1 = vld [vmem:[%s5496_s1 + $0x168] sm:$0xf] }
  0x5b   :  { %1397 = vmatpush.bf16.msra.mxu3 %v2889_v41  ;;  %v3565_v41 = vld [vmem:[%s5496_s1 + $0x3b4] sm:$0xf0]  ;;  %v2557_v45 = vor.u32 %v3501_v36, %v2556_v35  ;;  %v2780_v5 = vld [vmem:[%s5496_s1 + $0x368] sm:$0xf] }
  0x5c   :  { %1410 = vmatpush.bf16.msrb.mxu2 %v3033_v34  ;;  %v3537_v34 = vld [vmem:[%s5496_s1 + $0x2d4] sm:$0xf0]  ;;  %v2508_v14 = vld [vmem:[%s5496_s1 + $0x148] sm:$0xf] }
  0x5d   :  { %1370 = vmatpush.bf16.msra.mxu0 %v2617_v52  ;;  %v2701_v44 = vor.u32 %v3537_v34, %v2700_v33  ;;  %v2813_v52 = vor.u32 %v3565_v41, %v2812_v40  ;;  %v3493_v2 = vld [vmem:[%s5496_s1 + $0x174] sm:$0xf0]  ;;  %v2764_v18 = vld [vmem:[%s5496_s1 + $0x348] sm:$0xf] }
  0x5e   :  { %1384 = vmatpush.bf16.msra.mxu1 %v2745_v53  ;;  %v2413_v53 = vor.u32 %v3465_v46, %v2412_v43  ;;  %v3557_v6 = vld [vmem:[%s5496_s1 + $0x374] sm:$0xf0]  ;;  %v2525_v10 = vor.u32 %v3493_v2, %v2524_v1  ;;  %v2364_v20 = vld [vmem:[%s5496_s1 + $0x28] sm:$0xf] }
  0x5f   :  { %1398 = vmatpush.bf16.msra.mxu3 %v2873_v59  ;;  %v3457_v11 = vld [vmem:[%s5496_s1 + $0x54] sm:$0xf0]  ;;  %v2781_v16 = vor.u32 %v3557_v6, %v2780_v5  ;;  %v2636_v24 = vld [vmem:[%s5496_s1 + $0x248] sm:$0xf] }
  0x60   :  { %1411 = vmatpush.bf16.msrb.mxu2 %v3017_v48  ;;  %v3533_v48 = vld [vmem:[%s5496_s1 + $0x2b4] sm:$0xf0]  ;;  %v2748_v29 = vld [vmem:[%s5496_s1 + $0x328] sm:$0xf] }
  0x61   :  { %1371 = vmatpush.bf16.msra.mxu0 %v2601_v7  ;;  %v2685_v59 = vor.u32 %v3533_v48, %v2684_v47  ;;  %v2380_v7 = vld [vmem:[%s5496_s1 + $0x48] sm:$0xf]  ;;  %v3489_v15 = vld [vmem:[%s5496_s1 + $0x154] sm:$0xf0] }
  0x62   :  { %1385 = vmatpush.bf16.msra.mxu1 %v2729_v9  ;;  %v2669_v9 = vor.u32 %v3529_v0, %v2668_v63  ;;  %v3453_v23 = vld [vmem:[%s5496_s1 + $0x34] sm:$0xf0]  ;;  %v2348_v32 = vld [vmem:[%s5496_s1 + $0x8] sm:$0xf] }
  0x63   :  { %1399 = vmatpush.bf16.msra.mxu3 %v2857_v12  ;;  %v2652_v12 = vld [vmem:[%s5496_s1 + $0x268] sm:$0xf]  ;;  %v3485_v27 = vld [vmem:[%s5496_s1 + $0x134] sm:$0xf0] }
  0x64   :  { %1412 = vmatpush.bf16.msrb.mxu2 %v3001_v3  ;;  %1372 = vmatmul.bf16.vlgmr.msra.gmra.mxu0 %v4020_v54  ;;  %v2797_v3 = vor.u32 %v3561_v57, %v2796_v56  ;;  %v3449_v33 = vld [vmem:[%s5496_s1 + $0x14] sm:$0xf0]  ;;  %v2476_v36 = vld [vmem:[%s5496_s1 + $0x108] sm:$0xf]  ;;  %v2462_v57 = vld [vmem:[%s5496_s1 + $0xf8] sm:$0xf0] }
  0x65   :  { %1427 = vmatpush.bf16.msrb.mxu0 %v3113_v19  ;;  %1386 = vmatmul.bf16.vlgmr.msra.gmra.mxu1 %v4033_v60  ;;  %v3553_v19 = vld [vmem:[%s5496_s1 + $0x354] sm:$0xf0]  ;;  %v2972_v41 = vld [vmem:[%s5496_s1 + $0x4e8] sm:$0xf]  ;;  %v2349_v47 = vor.u32 %v3449_v33, %v2348_v32  ;;  %v3463_v33 = vld [vmem:[%s5496_s1 + $0x8c] sm:$0xf] }
  0x66   :  { %1434 = vmatpush.bf16.msrb.mxu1 %v2461_v13  ;;  %1400 = vmatmul.bf16.vlgmr.msra.gmra.mxu3 %v4246_v37  ;;  %v3525_v13 = vld [vmem:[%s5496_s1 + $0x274] sm:$0xf0]  ;;  %v2765_v28 = vor.u32 %v3553_v19, %v2764_v18  ;;  %v2732_v48 = vld [vmem:[%s5496_s1 + $0x308] sm:$0xf] }
  0x67   :  { %1448 = vmatpush.bf16.msrb.mxu3 %v2589_v17  ;;  %v2381_v17 = vor.u32 %v3457_v11, %v2380_v7  ;;  %v2653_v21 = vor.u32 %v3525_v13, %v2652_v12  ;;  %v3481_v40 = vld [vmem:[%s5496_s1 + $0x114] sm:$0xf0]  ;;  %v2956_v58 = vld [vmem:[%s5496_s1 + $0x4c8] sm:$0xf] }
  0x68   :  { %1413 = vmatpush.bf16.msrb.mxu2 %v2985_v22  ;;  %v2509_v22 = vor.u32 %v3489_v15, %v2508_v14  ;;  %v3605_v43 = vld [vmem:[%s5496_s1 + $0x4f4] sm:$0xf0]  ;;  %v3084_v62 = vld [vmem:[%s5496_s1 + $0x5c8] sm:$0xf]  ;;  %v3507_v15 = vld [vmem:[%s5496_s1 + $0x1ec] sm:$0xf] }
  0x69   :  { %1462 = vmatpush.bf16.msra.mxu0 %v2717_v30  ;;  %v2365_v30 = vor.u32 %v3453_v23, %v2364_v20  ;;  %v3637_v46 = vld [vmem:[%s5496_s1 + $0x5f4] sm:$0xf0]  ;;  %v2973_v56 = vor.u32 %v3605_v43, %v2972_v41  ;;  %v2604_v63 = vld [vmem:[%s5496_s1 + $0x208] sm:$0xf]  ;;  %v2558_v41 = vld [vmem:[%s5496_s1 + $0x1b8] sm:$0xf0] }
  0x6a   :  { %1435 = vmatpush.bf16.msrb.mxu1 %v2445_v26  ;;  %v2492_v26 = vld [vmem:[%s5496_s1 + $0x128] sm:$0xf]  ;;  %v3545_v49 = vld [vmem:[%s5496_s1 + $0x314] sm:$0xf0] }
  0x6b   :  { %1449 = vmatpush.bf16.msrb.mxu3 %v2573_v31  ;;  %1414 = vmatmul.bf16.vlgmr.msrb.gmra.mxu2 %v4257_v42  ;;  %v3549_v31 = vld [vmem:[%s5496_s1 + $0x334] sm:$0xf0]  ;;  %v2493_v35 = vor.u32 %v3485_v27, %v2492_v26  ;;  %v2733_v1 = vor.u32 %v3545_v49, %v2732_v48  ;;  %v2940_v11 = vld [vmem:[%s5496_s1 + $0x4a8] sm:$0xf]  ;;  %v3503_v27 = vld [vmem:[%s5496_s1 + $0x1cc] sm:$0xf] }
  0x6c   :  { %1476 = vmatpush.bf16.msra.mxu2 %v2845_v25  ;;  %v3521_v25 = vld [vmem:[%s5496_s1 + $0x254] sm:$0xf0]  ;;  %v3036_v43 = vld [vmem:[%s5496_s1 + $0x568] sm:$0xf]  ;;  %v2398_v48 = vld [vmem:[%s5496_s1 + $0x78] sm:$0xf0] }
  0x6d   :  { %1463 = vmatpush.bf16.msra.mxu0 %v2701_v44  ;;  %v2637_v34 = vor.u32 %v3521_v25, %v2636_v24  ;;  %v2749_v44 = vor.u32 %v3549_v31, %v2748_v29  ;;  %v3513_v0 = vld [vmem:[%s5496_s1 + $0x214] sm:$0xf0]  ;;  %v2924_v24 = vld [vmem:[%s5496_s1 + $0x488] sm:$0xf] }
  0x6e   :  { %1436 = vmatpush.bf16.msrb.mxu1 %v2429_v39  ;;  %v3517_v39 = vld [vmem:[%s5496_s1 + $0x234] sm:$0xf0]  ;;  %v2605_v7 = vor.u32 %v3513_v0, %v2604_v63  ;;  %v3052_v29 = vld [vmem:[%s5496_s1 + $0x588] sm:$0xf]  ;;  %v3455_v63 = vld [vmem:[%s5496_s1 + $0x4c] sm:$0xf] }
  0x6f   :  { %1450 = vmatpush.bf16.msrb.mxu3 %v2557_v45  ;;  %v3100_v45 = vld [vmem:[%s5496_s1 + $0x5e8] sm:$0xf]  ;;  %v3633_v2 = vld [vmem:[%s5496_s1 + $0x5d4] sm:$0xf0]  ;;  %v2382_v0 = vld [vmem:[%s5496_s1 + $0x58] sm:$0xf0] }
  0x70   :  { %1477 = vmatpush.bf16.msra.mxu2 %v2829_v38  ;;  %v2620_v38 = vld [vmem:[%s5496_s1 + $0x228] sm:$0xf]  ;;  %v3085_v12 = vor.u32 %v3633_v2, %v3084_v62  ;;  %v3597_v13 = vld [vmem:[%s5496_s1 + $0x4b4] sm:$0xf0] }
  0x71   :  { %1464 = vmatpush.bf16.msra.mxu0 %v2685_v59  ;;  %v2621_v51 = vor.u32 %v3517_v39, %v2620_v38  ;;  %v3601_v59 = vld [vmem:[%s5496_s1 + $0x4d4] sm:$0xf0]  ;;  %v2941_v20 = vor.u32 %v3597_v13, %v2940_v11  ;;  %v2876_v2 = vld [vmem:[%s5496_s1 + $0x428] sm:$0xf]  ;;  %v3451_v11 = vld [vmem:[%s5496_s1 + $0x2c] sm:$0xf] }
  0x72   :  { %1437 = vmatpush.bf16.msrb.mxu1 %v2413_v53  ;;  %v2477_v53 = vor.u32 %v3481_v40, %v2476_v36  ;;  %v2957_v6 = vor.u32 %v3601_v59, %v2956_v58  ;;  %v3629_v18 = vld [vmem:[%s5496_s1 + $0x5b4] sm:$0xf0]  ;;  %v2908_v36 = vld [vmem:[%s5496_s1 + $0x468] sm:$0xf]  ;;  %v3499_v40 = vld [vmem:[%s5496_s1 + $0x1ac] sm:$0xf] }
  0x73   :  { %1451 = vmatpush.bf16.msrb.mxu3 %v2541_v61  ;;  %v3101_v61 = vor.u32 %v3637_v46, %v3100_v45  ;;  %v3593_v26 = vld [vmem:[%s5496_s1 + $0x494] sm:$0xf0]  ;;  %v2561_v49 = vor.u32 %v3499_v40, %v2558_v41  ;;  %v3020_v58 = vld [vmem:[%s5496_s1 + $0x548] sm:$0xf]  ;;  %v2366_v13 = vld [vmem:[%s5496_s1 + $0x38] sm:$0xf0] }
  0x74   :  { %1478 = vmatpush.bf16.msra.mxu2 %v2813_v52  ;;  %3123 = vmatmul.msk.bf16.vlgmr.msrb.gmra.mxu0 %vm1234_vm0, %v4149_v50  ;;  %v3475_v52 = vld [vmem:[%s5496_s1 + $0xec] sm:$0xf]  ;;  %v2925_v32 = vor.u32 %v3593_v26, %v2924_v24  ;;  %v3589_v39 = vld [vmem:[%s5496_s1 + $0x474] sm:$0xf0]  ;;  %v2369_v24 = vor.u32 %v3451_v11, %v2366_v13  ;;  %v2846_v26 = vld [vmem:[%s5496_s1 + $0x3f8] sm:$0xf0] }
  0x75   :  { %1465 = vmatpush.bf16.msra.mxu0 %v2669_v9  ;;  %v2465_v5 = vor.u32 %v3475_v52, %v2462_v57  ;;  %v3471_v9 = vld [vmem:[%s5496_s1 + $0xcc] sm:$0xf]  ;;  %v2909_v46 = vor.u32 %v3589_v39, %v2908_v36  ;;  %v2542_v57 = vld [vmem:[%s5496_s1 + $0x198] sm:$0xf0]  ;;  %v3617_v59 = vld [vmem:[%s5496_s1 + $0x554] sm:$0xf0] }
  0x76   :  { %1438 = vmatpush.bf16.msrb.mxu1 %v2397_v4  ;;  %v3641_v4 = vld [vmem:[%s5496_s1 + $0x614] sm:$0xf0]  ;;  %v3483_v39 = vld [vmem:[%s5496_s1 + $0x12c] sm:$0xf]  ;;  %v2494_v40 = vld [vmem:[%s5496_s1 + $0x138] sm:$0xf0] }
  0x77   :  { %1452 = vmatpush.bf16.msrb.mxu3 %v2525_v10  ;;  %v2446_v10 = vld [vmem:[%s5496_s1 + $0xd8] sm:$0xf0] }
  0x78   :  { %1479 = vmatpush.bf16.msra.mxu2 %v2797_v3  ;;  %v3116_v3 = vld [vmem:[%s5496_s1 + $0x608] sm:$0xf]  ;;  %v2449_v19 = vor.u32 %v3471_v9, %v2446_v10  ;;  %v3613_v9 = vld [vmem:[%s5496_s1 + $0x534] sm:$0xf0]  ;;  %v2385_v10 = vor.u32 %v3455_v63, %v2382_v0  ;;  %v3086_v11 = vld [vmem:[%s5496_s1 + $0x5d8] sm:$0xf0] }
  0x79   :  { %1466 = vmatpush.bf16.msra.mxu0 %v2653_v21  ;;  %v3117_v14 = vor.u32 %v3641_v4, %v3116_v3  ;;  %v3467_v21 = vld [vmem:[%s5496_s1 + $0xac] sm:$0xf]  ;;  %v3021_v3 = vor.u32 %v3617_v59, %v3020_v58  ;;  %v3581_v4 = vld [vmem:[%s5496_s1 + $0x434] sm:$0xf0]  ;;  %v2478_v58 = vld [vmem:[%s5496_s1 + $0x118] sm:$0xf0] }
  0x7a   :  { %1439 = vmatpush.bf16.msrb.mxu1 %v2381_v17  ;;  %v3068_v17 = vld [vmem:[%s5496_s1 + $0x5a8] sm:$0xf]  ;;  %v2814_v59 = vld [vmem:[%s5496_s1 + $0x3b8] sm:$0xf0] }
  0x7b   :  { %1453 = vmatpush.bf16.msrb.mxu3 %v2509_v22  ;;  %v2430_v22 = vld [vmem:[%s5496_s1 + $0xb8] sm:$0xf0]  ;;  %v3069_v25 = vor.u32 %v3629_v18, %v3068_v17  ;;  %v2988_v18 = vld [vmem:[%s5496_s1 + $0x508] sm:$0xf] }
  0x7c   :  { %1480 = vmatpush.bf16.msra.mxu2 %v2781_v16  ;;  %v2590_v16 = vld [vmem:[%s5496_s1 + $0x1f8] sm:$0xf0]  ;;  %v2433_v31 = vor.u32 %v3467_v21, %v2430_v22  ;;  %v3609_v21 = vld [vmem:[%s5496_s1 + $0x514] sm:$0xf0]  ;;  %v3539_v22 = vld [vmem:[%s5496_s1 + $0x2ec] sm:$0xf] }
  0x7d   :  { %1467 = vmatpush.bf16.msra.mxu0 %v2637_v34  ;;  %v2593_v23 = vor.u32 %v3507_v15, %v2590_v16  ;;  %v2414_v34 = vld [vmem:[%s5496_s1 + $0x98] sm:$0xf0]  ;;  %v2860_v15 = vld [vmem:[%s5496_s1 + $0x408] sm:$0xf]  ;;  %v3577_v16 = vld [vmem:[%s5496_s1 + $0x414] sm:$0xf0] }
  0x7e   :  { %1440 = vmatpush.bf16.msrb.mxu1 %v2365_v30  ;;  %v3625_v30 = vld [vmem:[%s5496_s1 + $0x594] sm:$0xf0]  ;;  %v2417_v45 = vor.u32 %v3463_v33, %v2414_v34  ;;  %v3603_v33 = vld [vmem:[%s5496_s1 + $0x4ec] sm:$0xf]  ;;  %v2974_v34 = vld [vmem:[%s5496_s1 + $0x4f8] sm:$0xf0] }
  0x7f   :  { %1454 = vmatpush.bf16.msrb.mxu3 %v2493_v35  ;;  %v3053_v38 = vor.u32 %v3625_v30, %v3052_v29  ;;  %v2350_v29 = vld [vmem:[%s5496_s1 + $0x18] sm:$0xf0] }
  0x80   :  { %1481 = vmatpush.bf16.msra.mxu2 %v2765_v28  ;;  %v2574_v28 = vld [vmem:[%s5496_s1 + $0x1d8] sm:$0xf0] }
  0x81   :  { %1468 = vmatpush.bf16.msra.mxu0 %v2621_v51  ;;  %v2577_v35 = vor.u32 %v3503_v27, %v2574_v28  ;;  %v2892_v51 = vld [vmem:[%s5496_s1 + $0x448] sm:$0xf]  ;;  %v2861_v27 = vor.u32 %v3577_v16, %v2860_v15  ;;  %v3447_v28 = vld [vmem:[%s5496_s1 + $0xc] sm:$0xf]  ;;  %v2926_v15 = vld [vmem:[%s5496_s1 + $0x498] sm:$0xf0] }
  0x82   :  { %1441 = vmatpush.bf16.msrb.mxu1 %v2349_v47  ;;  %v3459_v47 = vld [vmem:[%s5496_s1 + $0x6c] sm:$0xf]  ;;  %v2353_v41 = vor.u32 %v3447_v28, %v2350_v29 }
  0x83   :  { %1455 = vmatpush.bf16.msrb.mxu3 %v2477_v53  ;;  %v3585_v53 = vld [vmem:[%s5496_s1 + $0x454] sm:$0xf0] }
  0x84   :  { %1482 = vmatpush.bf16.msra.mxu2 %v2749_v44  ;;  %v3621_v44 = vld [vmem:[%s5496_s1 + $0x574] sm:$0xf0]  ;;  %v2893_v62 = vor.u32 %v3585_v53, %v2892_v51  ;;  %v3531_v51 = vld [vmem:[%s5496_s1 + $0x2ac] sm:$0xf] }
  0x85   :  { %1442 = vmatmul.bf16.vlgmr.msrb.gmra.mxu1 %v4022_v55  ;;  %1469 = vmatpush.bf16.msra.mxu0 %v2605_v7  ;;  %v3037_v52 = vor.u32 %v3621_v44, %v3036_v43  ;;  %v3004_v7 = vld [vmem:[%s5496_s1 + $0x528] sm:$0xf]  ;;  %v3567_v43 = vld [vmem:[%s5496_s1 + $0x3cc] sm:$0xf]  ;;  %v2830_v44 = vld [vmem:[%s5496_s1 + $0x3d8] sm:$0xf0] }
  0x86   :  { %1490 = vmatpush.bf16.msra.mxu1 %v2973_v56  ;;  %1456 = vmatmul.bf16.vlgmr.msrb.gmra.mxu3 %v4058_v8  ;;  %v3495_v56 = vld [vmem:[%s5496_s1 + $0x18c] sm:$0xf]  ;;  %v3005_v17 = vor.u32 %v3613_v9, %v3004_v7  ;;  %v2833_v53 = vor.u32 %v3567_v43, %v2830_v44  ;;  %v2670_v7 = vld [vmem:[%s5496_s1 + $0x298] sm:$0xf0] }
  0x87   :  { %1504 = vmatpush.bf16.msra.mxu3 %v3101_v61  ;;  %v2401_v61 = vor.u32 %v3459_v47, %v2398_v48  ;;  %v2497_v48 = vor.u32 %v3483_v39, %v2494_v40  ;;  %v3559_v9 = vld [vmem:[%s5496_s1 + $0x38c] sm:$0xf]  ;;  %v2894_v40 = vld [vmem:[%s5496_s1 + $0x458] sm:$0xf0] }
  0x88   :  { %1483 = vmatpush.bf16.msra.mxu2 %v2733_v1  ;;  %1470 = vmatmul.bf16.vlgmr.msra.gmra.mxu0 %v4020_v54  ;;  %v2545_v1 = vor.u32 %v3495_v56, %v2542_v57  ;;  %v3563_v56 = vld [vmem:[%s5496_s1 + $0x3ac] sm:$0xf] }
  0x89   :  { %1525 = vmatpush.bf16.msrb.mxu0 %v3117_v14  ;;  %v3479_v57 = vld [vmem:[%s5496_s1 + $0x10c] sm:$0xf] }
  0x8a   :  { %1491 = vmatpush.bf16.msra.mxu1 %v2957_v6  ;;  %v2526_v6 = vld [vmem:[%s5496_s1 + $0x178] sm:$0xf0]  ;;  %v3583_v39 = vld [vmem:[%s5496_s1 + $0x44c] sm:$0xf] }
  0x8b   :  { %1505 = vmatpush.bf16.msra.mxu3 %v3085_v12  ;;  %1484 = vmatmul.bf16.vlgmr.msra.gmra.mxu2 %v4033_v60  ;;  %v2877_v12 = vor.u32 %v3581_v4, %v2876_v2  ;;  %v3595_v2 = vld [vmem:[%s5496_s1 + $0x4ac] sm:$0xf]  ;;  %v2817_v4 = vor.u32 %v3563_v56, %v2814_v59 }
  0x8c   :  { %1532 = vmatpush.bf16.msrb.mxu2 %v2465_v5  ;;  %v3491_v5 = vld [vmem:[%s5496_s1 + $0x16c] sm:$0xf] }
  0x8d   :  { %1546 = vmatpush.bf16.msra.mxu0 %v2593_v23  ;;  %v2529_v14 = vor.u32 %v3491_v5, %v2526_v6  ;;  %v2718_v23 = vld [vmem:[%s5496_s1 + $0x2f8] sm:$0xf0]  ;;  %v3527_v6 = vld [vmem:[%s5496_s1 + $0x28c] sm:$0xf] }
  0x8e   :  { %1492 = vmatpush.bf16.msra.mxu1 %v2941_v20  ;;  %v2510_v20 = vld [vmem:[%s5496_s1 + $0x158] sm:$0xf0]  ;;  %v2673_v13 = vor.u32 %v3527_v6, %v2670_v7  ;;  %v3515_v44 = vld [vmem:[%s5496_s1 + $0x22c] sm:$0xf]  ;;  %v3184_v7 = vld [vmem:[%s5499_s3 + $0x70] sm:$0xf] }
  0x8f   :  { %1506 = vmatpush.bf16.msra.mxu3 %v3069_v25  ;;  %v3571_v25 = vld [vmem:[%s5496_s1 + $0x3ec] sm:$0xf] }
  0x90   :  { %1533 = vmatpush.bf16.msrb.mxu2 %v2449_v19  ;;  %v3487_v19 = vld [vmem:[%s5496_s1 + $0x14c] sm:$0xf]  ;;  %v2849_v36 = vor.u32 %v3571_v25, %v2846_v26 }
  0x91   :  { %1547 = vmatpush.bf16.msra.mxu0 %v2577_v35  ;;  %v2513_v30 = vor.u32 %v3487_v19, %v2510_v20  ;;  %v3535_v35 = vld [vmem:[%s5496_s1 + $0x2cc] sm:$0xf]  ;;  %v2654_v19 = vld [vmem:[%s5496_s1 + $0x278] sm:$0xf0] }
  0x92   :  { %1493 = vmatpush.bf16.msra.mxu1 %v2925_v32  ;;  %v2721_v32 = vor.u32 %v3539_v22, %v2718_v23  ;;  %v3555_v20 = vld [vmem:[%s5496_s1 + $0x36c] sm:$0xf]  ;;  %v3070_v23 = vld [vmem:[%s5496_s1 + $0x5b8] sm:$0xf0] }
  0x93   :  { %1507 = vmatpush.bf16.msra.mxu3 %v3053_v38  ;;  %v2702_v38 = vld [vmem:[%s5496_s1 + $0x2d8] sm:$0xf0]  ;;  %v3627_v22 = vld [vmem:[%s5496_s1 + $0x5ac] sm:$0xf] }
  0x94   :  { %1534 = vmatpush.bf16.msrb.mxu2 %v2433_v31  ;;  %v2989_v31 = vor.u32 %v3609_v21, %v2988_v18  ;;  %v2705_v47 = vor.u32 %v3535_v35, %v2702_v38  ;;  %v3523_v18 = vld [vmem:[%s5496_s1 + $0x26c] sm:$0xf]  ;;  %v2782_v21 = vld [vmem:[%s5496_s1 + $0x378] sm:$0xf0]  ;;  %v3073_v29 = vor.u32 %v3627_v22, %v3070_v23 }
  0x95   :  { %1548 = vmatpush.bf16.msra.mxu0 %v2561_v49  ;;  %v2958_v49 = vld [vmem:[%s5496_s1 + $0x4d8] sm:$0xf0]  ;;  %v2657_v25 = vor.u32 %v3523_v18, %v2654_v19  ;;  %v3587_v26 = vld [vmem:[%s5496_s1 + $0x46c] sm:$0xf]  ;;  %v2785_v28 = vor.u32 %v3555_v20, %v2782_v21 }
  0x96   :  { %1494 = vmatpush.bf16.msra.mxu1 %v2909_v46  ;;  %v3599_v46 = vld [vmem:[%s5496_s1 + $0x4cc] sm:$0xf]  ;;  %v3006_v21 = vld [vmem:[%s5496_s1 + $0x538] sm:$0xf0] }
  0x97   :  { %1508 = vmatpush.bf16.msra.mxu3 %v3037_v52  ;;  %v2686_v52 = vld [vmem:[%s5496_s1 + $0x2b8] sm:$0xf0]  ;;  %v2961_v63 = vor.u32 %v3599_v46, %v2958_v49  ;;  %v3547_v46 = vld [vmem:[%s5496_s1 + $0x32c] sm:$0xf] }
  0x98   :  { %1535 = vmatpush.bf16.msrb.mxu2 %v2417_v45  ;;  %3124 = vmatmul.msk.bf16.vlgmr.msrb.gmra.mxu0 %vm1234_vm0, %v4149_v50  ;;  %v2977_v45 = vor.u32 %v3603_v33, %v2974_v34  ;;  %v2689_v0 = vor.u32 %v3531_v51, %v2686_v52  ;;  %v3623_v33 = vld [vmem:[%s5496_s1 + $0x58c] sm:$0xf]  ;;  %v3054_v34 = vld [vmem:[%s5496_s1 + $0x598] sm:$0xf0]  ;;  %v2897_v51 = vor.u32 %v3583_v39, %v2894_v40  ;;  %v3232_v40 = vld [vmem:[%s5499_s3 + $0xd0] sm:$0xf] }
  0x99   :  { %1549 = vmatpush.bf16.msra.mxu0 %v2545_v1  ;;  %v2481_v1 = vor.u32 %v3479_v57, %v2478_v58  ;;  %v3057_v43 = vor.u32 %v3623_v33, %v3054_v34  ;;  %v3038_v49 = vld [vmem:[%s5496_s1 + $0x578] sm:$0xf0]  ;;  %v3579_v56 = vld [vmem:[%s5496_s1 + $0x42c] sm:$0xf]  ;;  %v3168_v34 = vld [vmem:[%s5499_s3 + $0x50] sm:$0xf] }
  0x9a   :  { %1495 = vmatpush.bf16.msra.mxu1 %v2893_v62  ;;  %v3102_v62 = vld [vmem:[%s5496_s1 + $0x5f8] sm:$0xf0]  ;;  %v3611_v20 = vld [vmem:[%s5496_s1 + $0x52c] sm:$0xf] }
  0x9b   :  { %1509 = vmatpush.bf16.msra.mxu3 %v3021_v3  ;;  %v2942_v3 = vld [vmem:[%s5496_s1 + $0x4b8] sm:$0xf0] }
  0x9c   :  { %1536 = vmatpush.bf16.msrb.mxu2 %v2401_v61  ;;  %v3635_v61 = vld [vmem:[%s5496_s1 + $0x5ec] sm:$0xf]  ;;  %v2878_v57 = vld [vmem:[%s5496_s1 + $0x438] sm:$0xf0] }
  0x9d   :  { %1550 = vmatpush.bf16.msra.mxu0 %v2529_v14  ;;  %v3105_v5 = vor.u32 %v3635_v61, %v3102_v62  ;;  %v3591_v14 = vld [vmem:[%s5496_s1 + $0x48c] sm:$0xf]  ;;  %v2881_v6 = vor.u32 %v3579_v56, %v2878_v57 }
  0x9e   :  { %1496 = vmatpush.bf16.msra.mxu1 %v2877_v12  ;;  %v2945_v12 = vor.u32 %v3595_v2, %v2942_v3  ;;  %v3511_v62 = vld [vmem:[%s5496_s1 + $0x20c] sm:$0xf]  ;;  %v2734_v2 = vld [vmem:[%s5496_s1 + $0x318] sm:$0xf0] }
  0x9f   :  { %1510 = vmatpush.bf16.msra.mxu3 %v3005_v17  ;;  %v3615_v3 = vld [vmem:[%s5496_s1 + $0x54c] sm:$0xf] }
  0xa0   :  { %1537 = vmatpush.bf16.msrb.mxu2 %v2385_v10  ;;  %v2798_v10 = vld [vmem:[%s5496_s1 + $0x398] sm:$0xf0] }
  0xa1   :  { %1551 = vmatpush.bf16.msra.mxu0 %v2513_v30  ;;  %v2801_v16 = vor.u32 %v3559_v9, %v2798_v10  ;;  %v3519_v30 = vld [vmem:[%s5496_s1 + $0x24c] sm:$0xf]  ;;  %v3657_v9 = vld [vmem:[%s5499_s3 + $0x74] sm:$0xf0] }
  0xa2   :  { %1497 = vmatpush.bf16.msra.mxu1 %v2861_v27  ;;  %v2910_v27 = vld [vmem:[%s5496_s1 + $0x478] sm:$0xf0]  ;;  %v3575_v10 = vld [vmem:[%s5496_s1 + $0x40c] sm:$0xf]  ;;  %v3185_v19 = vor.u32 %v3657_v9, %v3184_v7 }
  0xa3   :  { %1511 = vmatpush.bf16.msra.mxu3 %v2989_v31  ;;  %v3551_v31 = vld [vmem:[%s5496_s1 + $0x34c] sm:$0xf]  ;;  %v2913_v35 = vor.u32 %v3587_v26, %v2910_v27  ;;  %v3240_v27 = vld [vmem:[%s5499_s3 + $0xe0] sm:$0xf] }
  0xa4   :  { %1538 = vmatpush.bf16.msrb.mxu2 %v2369_v24  ;;  %v2929_v24 = vor.u32 %v3591_v14, %v2926_v15  ;;  %v1247_v58 = vpop.f32.mrf.mxu0 }
  0xa5   :  { %1498 = vmatmul.bf16.vlgmr.msra.gmra.mxu1 %v4246_v37  ;;  %1552 = vmatpush.bf16.msra.mxu0 %v2497_v48  ;;  %v3619_v48 = vld [vmem:[%s5496_s1 + $0x56c] sm:$0xf] }
  0xa6   :  { %1560 = vmatpush.bf16.msrb.mxu1 %v2721_v32  ;;  %1512 = vmatmul.bf16.vlgmr.msra.gmra.mxu3 %v4257_v42  ;;  %v2766_v32 = vld [vmem:[%s5496_s1 + $0x358] sm:$0xf0]  ;;  %v3041_v61 = vor.u32 %v3619_v48, %v3038_v49  ;;  %v3651_v48 = vld [vmem:[%s5499_s3 + $0x44] sm:$0xf0] }
  0xa7   :  { %1574 = vmatpush.bf16.msrb.mxu3 %v2849_v36  ;;  %v4960_v36 = vld [vmem:[%s5498_s2] sm:$0xf] }
  0xa8   :  { %1539 = vmatpush.bf16.msrb.mxu2 %v2353_v41  ;;  %v2769_v41 = vor.u32 %v3551_v31, %v2766_v32  ;;  %v246_v52 = vperm.slane %v4960_v36, 0  ;;  %v3607_v31 = vld [vmem:[%s5496_s1 + $0x50c] sm:$0xf]  ;;  %v2990_v32 = vld [vmem:[%s5496_s1 + $0x518] sm:$0xf0] }
  0xa9   :  { %1553 = vmatpush.bf16.msra.mxu0 %v2481_v1  ;;  %v1261_v1 = vpop.f32.mrf.mxu1 }
  0xaa   :  { %1561 = vmatpush.bf16.msrb.mxu1 %v2705_v47  ;;  %v2750_v47 = vld [vmem:[%s5496_s1 + $0x338] sm:$0xf0]  ;;  %v1248_v18 = vadd.f32 %v1247_v58, %v246_v52  ;;  %v3152_v58 = vld [vmem:[%s5499_s3 + $0x30] sm:$0xf] }
  0xab   :  { %1575 = vmatpush.bf16.msrb.mxu3 %v2833_v53  ;;  %1540 = vmatmul.bf16.vlgmr.msrb.gmra.mxu2 %v4022_v55  ;;  %v3631_v55 = vld [vmem:[%s5496_s1 + $0x5cc] sm:$0xf]  ;;  %v2753_v59 = vor.u32 %v3547_v46, %v2750_v47  ;;  %v3160_v47 = vld [vmem:[%s5499_s3 + $0x40] sm:$0xf] }
  0xac   :  { %1588 = vmatpush.bf16.msra.mxu2 %v2977_v45  ;;  %v3089_v17 = vor.u32 %v3631_v55, %v3086_v11  ;;  %1554 = vmatmul.bf16.vlgmr.msra.gmra.mxu0 %v4058_v8  ;;  %v2638_v8 = vld [vmem:[%s5496_s1 + $0x258] sm:$0xf0]  ;;  %v1249_v33 = vpop.f32.mrf.mxu0  ;;  %v3161_v56 = vor.u32 %v3651_v48, %v3160_v47 }
  0xad   :  { %1602 = vmatpush.bf16.msrb.mxu0 %v3105_v5  ;;  %v2641_v38 = vor.u32 %v3519_v30, %v2638_v8  ;;  %v2622_v45 = vld [vmem:[%s5496_s1 + $0x238] sm:$0xf0]  ;;  %v1275_v5 = vpop.f32.mrf.mxu2  ;;  %v1262_v30 = vadd.f32 %v1261_v1, %v1248_v18  ;;  %v1250_v46 = vadd.f32 %v1249_v33, %v246_v52  ;;  %v3667_v52 = vld [vmem:[%s5499_s3 + $0xc4] sm:$0xf0]  ;;  %v3665_v1 = vld [vmem:[%s5499_s3 + $0xb4] sm:$0xf0] }
  0xae   :  { %1562 = vmatpush.bf16.msrb.mxu1 %v2689_v0  ;;  %v2625_v53 = vor.u32 %v3515_v44, %v2622_v45  ;;  %v3543_v0 = vld [vmem:[%s5496_s1 + $0x30c] sm:$0xf]  ;;  %v2862_v11 = vld [vmem:[%s5496_s1 + $0x418] sm:$0xf0]  ;;  %v2993_v44 = vor.u32 %v3607_v31, %v2990_v32  ;;  %v3659_v31 = vld [vmem:[%s5499_s3 + $0x84] sm:$0xf0] }
  0xaf   :  { %1576 = vmatpush.bf16.msrb.mxu3 %v2817_v4  ;;  %v3022_v4 = vld [vmem:[%s5496_s1 + $0x558] sm:$0xf0]  ;;  %v2737_v14 = vor.u32 %v3543_v0, %v2734_v2  ;;  %v2865_v23 = vor.u32 %v3575_v10, %v2862_v11  ;;  %v1276_v45 = vadd.f32 %v1275_v5, %v1262_v30  ;;  %v3216_v0 = vld [vmem:[%s5499_s3 + $0xb0] sm:$0xf]  ;;  %v3208_v10 = vld [vmem:[%s5499_s3 + $0xa0] sm:$0xf] }
  0xb0   :  { %1589 = vmatpush.bf16.msra.mxu2 %v2961_v63  ;;  %v2606_v63 = vld [vmem:[%s5496_s1 + $0x218] sm:$0xf0]  ;;  %v3025_v15 = vor.u32 %v3615_v3, %v3022_v4  ;;  %v3217_v7 = vor.u32 %v3665_v1, %v3216_v0  ;;  %v3672_v32 = vld [vmem:[%s5499_s3 + $0xf4] sm:$0xf]  ;;  %v3226_v0 = vld [vmem:[%s5499_s3 + $0xc8] sm:$0xf0] }
  0xb1   :  { %1603 = vmatpush.bf16.msrb.mxu0 %v3089_v17  ;;  %v2609_v55 = vor.u32 %v3511_v62, %v2606_v63  ;;  %v3118_v17 = vld [vmem:[%s5496_s1 + $0x618] sm:$0xf0]  ;;  %v1263_v39 = vpop.f32.mrf.mxu1 }
  0xb2   :  { %1563 = vmatpush.bf16.msrb.mxu1 %v2673_v13  ;;  %v3673_v13 = vld [vmem:[%s5499_s3 + $0xf4] sm:$0xf0]  ;;  %v3250_v33 = vld [vmem:[%s5499_s3 + $0xf8] sm:$0xf0] }
  0xb3   :  { %1577 = vmatpush.bf16.msrb.mxu3 %v2801_v16  ;;  %v3639_v16 = vld [vmem:[%s5496_s1 + $0x60c] sm:$0xf] }
  0xb4   :  { %1590 = vmatpush.bf16.msra.mxu2 %v2945_v12  ;;  %v3248_v12 = vld [vmem:[%s5499_s3 + $0xf0] sm:$0xf]  ;;  %v3121_v26 = vor.u32 %v3639_v16, %v3118_v17 }
  0xb5   :  { %1604 = vmatpush.bf16.msrb.mxu0 %v3073_v29  ;;  %v3249_v22 = vor.u32 %v3673_v13, %v3248_v12  ;;  %v3009_v29 = vor.u32 %v3611_v20, %v3006_v21  ;;  %v3200_v20 = vld [vmem:[%s5499_s3 + $0x90] sm:$0xf]  ;;  %v3661_v21 = vld [vmem:[%s5499_s3 + $0x94] sm:$0xf0] }
  0xb6   :  { %1564 = vmatpush.bf16.msrb.mxu1 %v2657_v25  ;;  %v3655_v25 = vld [vmem:[%s5499_s3 + $0x64] sm:$0xf0] }
  0xb7   :  { %1578 = vmatpush.bf16.msrb.mxu3 %v2785_v28  ;;  %v3671_v28 = vld [vmem:[%s5499_s3 + $0xe4] sm:$0xf0] }
  0xb8   :  { %1591 = vmatpush.bf16.msra.mxu2 %v2929_v24  ;;  %v3176_v24 = vld [vmem:[%s5499_s3 + $0x60] sm:$0xf] }
  0xb9   :  { %1605 = vmatpush.bf16.msrb.mxu0 %v3057_v43  ;;  %v3177_v8 = vor.u32 %v3655_v25, %v3176_v24  ;;  %v1277_v43 = vpop.f32.mrf.mxu2  ;;  %v3128_v24 = vld [vmem:[%s5499_s3] sm:$0xf] }
  0xba   :  { %1565 = vmatpush.bf16.msrb.mxu1 %v2641_v38  ;;  %v3241_v38 = vor.u32 %v3671_v28, %v3240_v27  ;;  %v3656_v27 = vld [vmem:[%s5499_s3 + $0x74] sm:$0xf]  ;;  %v3186_v28 = vld [vmem:[%s5499_s3 + $0x78] sm:$0xf0] }
  0xbb   :  { %1579 = vmatpush.bf16.msrb.mxu3 %v2769_v41  ;;  %v1289_v41 = vpop.f32.mrf.mxu3 }
  0xbc   :  { %1592 = vmatpush.bf16.msra.mxu2 %v2913_v35  ;;  %v3653_v35 = vld [vmem:[%s5499_s3 + $0x54] sm:$0xf0] }
  0xbd   :  { %1606 = vmatpush.bf16.msrb.mxu0 %v3041_v61 }
  0xbe   :  { %1566 = vmatpush.bf16.msrb.mxu1 %v2625_v53  ;;  %v1264_v53 = vadd.f32 %v1263_v39, %v1250_v46  ;;  %v3670_v46 = vld [vmem:[%s5499_s3 + $0xe4] sm:$0xf] }
  0xbf   :  { %1580 = vmatpush.bf16.msrb.mxu3 %v2753_v59  ;;  %v3649_v59 = vld [vmem:[%s5499_s3 + $0x34] sm:$0xf0] }
  0xc0   :  { %1593 = vmatpush.bf16.msra.mxu2 %v2897_v51  ;;  %v3224_v51 = vld [vmem:[%s5499_s3 + $0xc0] sm:$0xf]  ;;  %v1278_v3 = vadd.f32 %v1277_v43, %v1264_v53  ;;  %v3153_v4 = vor.u32 %v3649_v59, %v3152_v58  ;;  %v3654_v43 = vld [vmem:[%s5499_s3 + $0x64] sm:$0xf]  ;;  %v3668_v53 = vld [vmem:[%s5499_s3 + $0xd4] sm:$0xf] }
  0xc1   :  { %1607 = vmatpush.bf16.msrb.mxu0 %v3025_v15  ;;  %v1303_v57 = vpop.f32.mrf.mxu0  ;;  %v3225_v61 = vor.u32 %v3667_v52, %v3224_v51  ;;  %v1331_v2 = vpop.f32.mrf.mxu2  ;;  %v3645_v15 = vld [vmem:[%s5499_s3 + $0x14] sm:$0xf0]  ;;  %v3652_v51 = vld [vmem:[%s5499_s3 + $0x54] sm:$0xf]  ;;  %v3170_v52 = vld [vmem:[%s5499_s3 + $0x58] sm:$0xf0] }
  0xc2   :  { %1567 = vmatpush.bf16.msrb.mxu1 %v2609_v55  ;;  %v1317_v63 = vpop.f32.mrf.mxu1  ;;  %v3663_v55 = vld [vmem:[%s5499_s3 + $0xa4] sm:$0xf0]  ;;  %v3173_v58 = vor.u32 %v3652_v51, %v3170_v52  ;;  %v3650_v59 = vld [vmem:[%s5499_s3 + $0x44] sm:$0xf] }
  0xc3   :  { %1581 = vmatpush.bf16.msrb.mxu3 %v2737_v14  ;;  %v1291_v5 = vpop.f32.mrf.mxu3  ;;  %v3136_v14 = vld [vmem:[%s5499_s3 + $0x10] sm:$0xf]  ;;  %v3209_v16 = vor.u32 %v3663_v55, %v3208_v10  ;;  %v3218_v10 = vld [vmem:[%s5499_s3 + $0xb8] sm:$0xf0] }
  0xc4   :  { %1594 = vmatpush.bf16.msra.mxu2 %v2881_v6  ;;  %v3144_v6 = vld [vmem:[%s5499_s3 + $0x20] sm:$0xf]  ;;  %v1292_v11 = vadd.f32 %v1291_v5, %v1278_v3  ;;  %v3154_v5 = vld [vmem:[%s5499_s3 + $0x38] sm:$0xf0] }
  0xc5   :  { %1568 = vmatmul.bf16.vlgmr.msrb.gmra.mxu1 %v4020_v54  ;;  %v3669_v54 = vld [vmem:[%s5499_s3 + $0xd4] sm:$0xf0]  ;;  %1608 = vmatpush.bf16.msrb.mxu0 %v3009_v29 }
  0xc6   :  { %2054 = vmatpush.bf16.msra.mxu1 %v3249_v22  ;;  %1582 = vmatmul.bf16.vlgmr.msrb.gmra.mxu3 %v4033_v60  ;;  %v3169_v60 = vor.u32 %v3653_v35, %v3168_v34  ;;  %v3233_v49 = vor.u32 %v3669_v54, %v3232_v40 }
  0xc7   :  { %2040 = vmatpush.bf16.msra.mxu3 %v3185_v19 }
  0xc8   :  { %1595 = vmatpush.bf16.msra.mxu2 %v2865_v23  ;;  %v3137_v23 = vor.u32 %v3645_v15, %v3136_v14 }
  0xc9   :  { %1609 = vmatpush.bf16.msrb.mxu0 %v2993_v44  ;;  %v1305_v13 = vpop.f32.mrf.mxu0  ;;  %v1333_v25 = vpop.f32.mrf.mxu2  ;;  %v3178_v44 = vld [vmem:[%s5499_s3 + $0x68] sm:$0xf0] }
  0xca   :  { %2055 = vmatpush.bf16.msra.mxu1 %v3241_v38  ;;  %v1306_v18 = vadd.f32 %v1305_v13, %v1292_v11  ;;  %v1319_v19 = vpop.f32.mrf.mxu1  ;;  %v3189_v38 = vor.u32 %v3656_v27, %v3186_v28  ;;  %v3689_v13 = vld [vmem:[%s5499_s3 + $0x174] sm:$0xf0]  ;;  %v3138_v27 = vld [vmem:[%s5499_s3 + $0x18] sm:$0xf0] }
  0xcb   :  { %2041 = vmatpush.bf16.msra.mxu3 %v3177_v8  ;;  %1596 = vmatmul.bf16.vlgmr.msra.gmra.mxu2 %v4246_v37  ;;  %v1290_v37 = vadd.f32 %v1289_v41, %v1276_v45  ;;  %v3192_v8 = vld [vmem:[%s5499_s3 + $0x80] sm:$0xf]  ;;  %v1345_v41 = vpop.f32.mrf.mxu3  ;;  %v3253_v45 = vor.u32 %v3672_v32, %v3250_v33 }
  0xcc   :  { %1623 = vmatpush.bf16.msrb.mxu2 %v3121_v26  ;;  %1610 = vmatmul.bf16.vlgmr.msrb.gmra.mxu0 %v4257_v42  ;;  %v3647_v42 = vld [vmem:[%s5499_s3 + $0x24] sm:$0xf0]  ;;  %v1320_v22 = vadd.f32 %v1319_v19, %v1306_v18  ;;  %v3193_v39 = vor.u32 %v3659_v31, %v3192_v8  ;;  %v3202_v8 = vld [vmem:[%s5499_s3 + $0x98] sm:$0xf0] }
  0xcd   :  { %v1304_v62 = vadd.f32 %v1303_v57, %v1290_v37  ;;  %v3145_v12 = vor.u32 %v3647_v42, %v3144_v6  ;;  %v3643_v26 = vld [vmem:[%s5499_s3 + $0x4] sm:$0xf0]  ;;  %v247_v57 = vperm.slane %v4960_v36, 1 }
  0xce   :  { %2056 = vmatpush.bf16.msra.mxu1 %v3233_v49  ;;  %v1334_v30 = vadd.f32 %v1333_v25, %v1320_v22  ;;  %v3129_v35 = vor.u32 %v3643_v26, %v3128_v24  ;;  %v3181_v49 = vor.u32 %v3654_v43, %v3178_v44  ;;  %v3644_v26 = vld [vmem:[%s5499_s3 + $0x14] sm:$0xf]  ;;  %v3687_v31 = vld [vmem:[%s5499_s3 + $0x164] sm:$0xf0] }
  0xcf   :  { %2042 = vmatpush.bf16.msra.mxu3 %v3169_v60  ;;  %v1318_v9 = vadd.f32 %v1317_v63, %v1304_v62  ;;  %v3242_v60 = vld [vmem:[%s5499_s3 + $0xe8] sm:$0xf0]  ;;  %v3666_v63 = vld [vmem:[%s5499_s3 + $0xc4] sm:$0xf]  ;;  %v1346_v1 = vadd.f32 %v1345_v41, %v247_v57 }
  0xd0   :  { %v1634_v34 = vmul.f32 0.2, %v1334_v30  ;;  %v3245_v37 = vor.u32 %v3670_v46, %v3242_v60  ;;  %v3229_v6 = vor.u32 %v3666_v63, %v3226_v0  ;;  %v3130_v41 = vld [vmem:[%s5499_s3 + $0x8] sm:$0xf0]  ;;  %v3658_v46 = vld [vmem:[%s5499_s3 + $0x84] sm:$0xf] }
  0xd1   :  { %v1332_v17 = vadd.f32 %v1331_v2, %v1318_v9  ;;  %v1359_v48 = vpop.f32.mrf.mxu2  ;;  %v3664_v9 = vld [vmem:[%s5499_s3 + $0xb4] sm:$0xf]  ;;  %v3194_v60 = vld [vmem:[%s5499_s3 + $0x88] sm:$0xf0] }
  0xd2   :  { %2057 = vmatpush.bf16.msra.mxu1 %v3225_v61  ;;  %v1642_v54 = vmax.f32 %v1334_v30, %v1634_v34  ;;  %v3162_v61 = vld [vmem:[%s5499_s3 + $0x48] sm:$0xf0]  ;;  %v1360_v55 = vadd.f32 %v1359_v48, %v1346_v1  ;;  %v3221_v18 = vor.u32 %v3664_v9, %v3218_v10  ;;  %v3660_v30 = vld [vmem:[%s5499_s3 + $0x94] sm:$0xf]  ;;  %v3296_v34 = vld [vmem:[%s5499_s3 + $0x150] sm:$0xf]  ;;  %v3197_v52 = vor.u32 %v3658_v46, %v3194_v60 }
  0xd3   :  { %2043 = vmatpush.bf16.msra.mxu3 %v3161_v56  ;;  %v1630_v29 = vmul.f32 0.2, %v1332_v17  ;;  %v3234_v56 = vld [vmem:[%s5499_s3 + $0xd8] sm:$0xf0]  ;;  %v1347_v2 = vpop.f32.mrf.mxu3  ;;  %v3165_v3 = vor.u32 %v3650_v59, %v3162_v61  ;;  %v3205_v43 = vor.u32 %v3660_v30, %v3202_v8  ;;  %v3280_v59 = vld [vmem:[%s5499_s3 + $0x130] sm:$0xf] }
  0xd4   :  { %v3237_v62 = vor.u32 %v3668_v53, %v3234_v56  ;;  %v1348_v14 = vadd.f32 %v1347_v2, %v247_v57  ;;  %v3288_v57 = vld [vmem:[%s5499_s3 + $0x140] sm:$0xf]  ;;  %v3703_v60 = vld [vmem:[%s5499_s3 + $0x1e4] sm:$0xf0] }
  0xd5   :  { %v1638_v40 = vmax.f32 %v1332_v17, %v1630_v29  ;;  %v3146_v17 = vld [vmem:[%s5499_s3 + $0x28] sm:$0xf0]  ;;  %v3368_v46 = vld [vmem:[%s5499_s3 + $0x1e0] sm:$0xf] }
  0xd6   :  { %2058 = vmatpush.bf16.msra.mxu1 %v3217_v7 }
  0xd7   :  { %2044 = vmatpush.bf16.msra.mxu3 %v3153_v4  ;;  %v5165_v47 = vpack.c.bf16 %v1642_v54, %v1638_v40  ;;  %v3648_v4 = vld [vmem:[%s5499_s3 + $0x34] sm:$0xf]  ;;  %v3642_v54 = vld [vmem:[%s5499_s3 + $0x4] sm:$0xf] }
  0xd8   :  { %v3157_v11 = vor.u32 %v3648_v4, %v3154_v5 }
  0xd9   :  { %v1361_v7 = vpop.f32.mrf.mxu2 }
  0xda   :  { %2059 = vmatpush.bf16.msra.mxu1 %v3209_v16  ;;  %v3646_v16 = vld [vmem:[%s5499_s3 + $0x24] sm:$0xf]  ;;  %v1362_v24 = vadd.f32 %v1361_v7, %v1348_v14  ;;  %v3679_v7 = vld [vmem:[%s5499_s3 + $0x124] sm:$0xf0] }
  0xdb   :  { %2045 = vmatpush.bf16.msra.mxu3 %v3145_v12  ;;  %3125 = vmatmul.msk.bf16.vlgmr.msrb.gmra.mxu2 %vm1234_vm0, %v4149_v50  ;;  %v3201_v50 = vor.u32 %v3661_v21, %v3200_v20  ;;  %v3312_v12 = vld [vmem:[%s5499_s3 + $0x170] sm:$0xf]  ;;  %v3662_v20 = vld [vmem:[%s5499_s3 + $0xa4] sm:$0xf]  ;;  %v3210_v21 = vld [vmem:[%s5499_s3 + $0xa8] sm:$0xf0] }
  0xdc   :  { %v3313_v19 = vor.u32 %v3689_v13, %v3312_v12  ;;  %v3213_v28 = vor.u32 %v3662_v20, %v3210_v21  ;;  %v3686_v21 = vld [vmem:[%s5499_s3 + $0x164] sm:$0xf] }
  0xde   :  { %2060 = vmatpush.bf16.msra.mxu1 %v3201_v50  ;;  %2068 = vmatpush.bf16.msra.mxu2 %v3313_v19  ;;  %v3304_v50 = vld [vmem:[%s5499_s3 + $0x160] sm:$0xf]  ;;  %v3314_v19 = vld [vmem:[%s5499_s3 + $0x178] sm:$0xf0] }
  0xdf   :  { %2046 = vmatpush.bf16.msra.mxu3 %v3137_v23  ;;  %v3149_v23 = vor.u32 %v3646_v16, %v3146_v17  ;;  %v3305_v33 = vor.u32 %v3687_v31, %v3304_v50  ;;  %v3675_v16 = vld [vmem:[%s5499_s3 + $0x104] sm:$0xf0]  ;;  %v3682_v50 = vld [vmem:[%s5499_s3 + $0x144] sm:$0xf]  ;;  %v248_v31 = vperm.slane %v4960_v36, 2 }
  0xe1   :  { %v1373_v42 = vpop.f32.mrf.mxu0 }
  0xe2   :  { %2061 = vmatpush.bf16.msra.mxu1 %v3193_v39  ;;  %v1387_v15 = vpop.f32.mrf.mxu1  ;;  %v1374_v22 = vadd.f32 %v1373_v42, %v1360_v55  ;;  %v3685_v39 = vld [vmem:[%s5499_s3 + $0x154] sm:$0xf0]  ;;  %2069 = vmatpush.bf16.msra.mxu2 %v3305_v33  ;;  %v3272_v42 = vld [vmem:[%s5499_s3 + $0x120] sm:$0xf]  ;;  %v3264_v55 = vld [vmem:[%s5499_s3 + $0x110] sm:$0xf] }
  0xe3   :  { %2047 = vmatpush.bf16.msra.mxu3 %v3129_v35  ;;  %v3297_v44 = vor.u32 %v3685_v39, %v3296_v34  ;;  %v3273_v9 = vor.u32 %v3679_v7, %v3272_v42  ;;  %v3282_v33 = vld [vmem:[%s5499_s3 + $0x138] sm:$0xf0]  ;;  %v3705_v39 = vld [vmem:[%s5499_s3 + $0x1f4] sm:$0xf0] }
  0xe4   :  { %v1388_v32 = vadd.f32 %v1387_v15, %v1374_v22  ;;  %v3256_v15 = vld [vmem:[%s5499_s3 + $0x100] sm:$0xf]  ;;  %v3306_v22 = vld [vmem:[%s5499_s3 + $0x168] sm:$0xf0] }
  0xe5   :  { %v3257_v17 = vor.u32 %v3675_v16, %v3256_v15 }
  0xe6   :  { %2110 = vmatpush.bf16.msrb.mxu1 %v3253_v45  ;;  %2048 = vmatmul.bf16.vlgmr.msra.gmra.mxu3 %v5165_v47 }
  0xe7   :  { %2096 = vmatpush.bf16.msrb.mxu3 %v3189_v38  ;;  %v3141_v38 = vor.u32 %v3644_v26, %v3138_v27  ;;  %2070 = vmatpush.bf16.msra.mxu2 %v3297_v44  ;;  %v3298_v26 = vld [vmem:[%s5499_s3 + $0x158] sm:$0xf0] }
  0xe9   :  { %v1401_v25 = vpop.f32.mrf.mxu3  ;;  %v1375_v29 = vpop.f32.mrf.mxu0 }
  0xea   :  { %2111 = vmatpush.bf16.msrb.mxu1 %v3245_v37  ;;  %v1376_v40 = vadd.f32 %v1375_v29, %v1362_v24  ;;  %v1389_v45 = vpop.f32.mrf.mxu1  ;;  %v1402_v48 = vadd.f32 %v1401_v25, %v1388_v32  ;;  %v3684_v25 = vld [vmem:[%s5499_s3 + $0x154] sm:$0xf]  ;;  %v3290_v29 = vld [vmem:[%s5499_s3 + $0x148] sm:$0xf0] }
  0xeb   :  { %2097 = vmatpush.bf16.msrb.mxu3 %v3181_v49  ;;  %v3133_v49 = vor.u32 %v3642_v54, %v3130_v41  ;;  %v3301_v27 = vor.u32 %v3684_v25, %v3298_v26  ;;  %v3293_v8 = vor.u32 %v3682_v50, %v3290_v29  ;;  %v3680_v32 = vld [vmem:[%s5499_s3 + $0x134] sm:$0xf]  ;;  %v3678_v41 = vld [vmem:[%s5499_s3 + $0x124] sm:$0xf]  ;;  %v3328_v25 = vld [vmem:[%s5499_s3 + $0x190] sm:$0xf] }
  0xec   :  { %v1390_v51 = vadd.f32 %v1389_v45, %v1376_v40  ;;  %v3693_v26 = vld [vmem:[%s5499_s3 + $0x194] sm:$0xf0] }
  0xed   :  { %v3329_v50 = vor.u32 %v3693_v26, %v3328_v25 }
  0xee   :  { %2112 = vmatpush.bf16.msrb.mxu1 %v3237_v62  ;;  %v1415_v35 = vpop.f32.mrf.mxu2  ;;  %v3681_v62 = vld [vmem:[%s5499_s3 + $0x134] sm:$0xf0] }
  0xef   :  { %2098 = vmatpush.bf16.msrb.mxu3 %v3173_v58  ;;  %v1416_v56 = vadd.f32 %v1415_v35, %v1402_v48  ;;  %v3683_v58 = vld [vmem:[%s5499_s3 + $0x144] sm:$0xf0]  ;;  %v3281_v1 = vor.u32 %v3681_v62, %v3280_v59  ;;  %v3285_v35 = vor.u32 %v3680_v32, %v3282_v33  ;;  %v3360_v59 = vld [vmem:[%s5499_s3 + $0x1d0] sm:$0xf] }
  0xf0   :  { %v3289_v61 = vor.u32 %v3683_v58, %v3288_v57 }
  0xf1   :  { %v1403_v37 = vpop.f32.mrf.mxu3  ;;  %v1429_v53 = vpop.f32.mrf.mxu0 }
  0xf2   :  { %2113 = vmatpush.bf16.msrb.mxu1 %v3229_v6  ;;  %v1404_v63 = vadd.f32 %v1403_v37, %v1390_v51  ;;  %2071 = vmatpush.bf16.msra.mxu2 %v3289_v61  ;;  %v1430_v2 = vadd.f32 %v1429_v53, %v1416_v56  ;;  %v3676_v51 = vld [vmem:[%s5499_s3 + $0x114] sm:$0xf]  ;;  %v3701_v61 = vld [vmem:[%s5499_s3 + $0x1d4] sm:$0xf0] }
  0xf3   :  { %2099 = vmatpush.bf16.msrb.mxu3 %v3165_v3 }
  0xf4   :  { %v1631_v5 = vmul.f32 0.2, %v1430_v2 }
  0xf6   :  { %2114 = vmatpush.bf16.msrb.mxu1 %v3221_v18  ;;  %v1417_v0 = vpop.f32.mrf.mxu2  ;;  %2072 = vmatpush.bf16.msra.mxu2 %v3281_v1  ;;  %v1639_v12 = vmax.f32 %v1430_v2, %v1631_v5  ;;  %v3688_v18 = vld [vmem:[%s5499_s3 + $0x174] sm:$0xf]  ;;  %v3674_v1 = vld [vmem:[%s5499_s3 + $0x104] sm:$0xf]  ;;  %v3258_v2 = vld [vmem:[%s5499_s3 + $0x108] sm:$0xf0] }
  0xf7   :  { %2100 = vmatpush.bf16.msrb.mxu3 %v3157_v11  ;;  %v1418_v3 = vadd.f32 %v1417_v0, %v1404_v63  ;;  %v3317_v20 = vor.u32 %v3688_v18, %v3314_v19  ;;  %v3361_v63 = vor.u32 %v3701_v61, %v3360_v59  ;;  %v3699_v5 = vld [vmem:[%s5499_s3 + $0x1c4] sm:$0xf0] }
  0xf8   :  { %v3695_v18 = vld [vmem:[%s5499_s3 + $0x1a4] sm:$0xf0] }
  0xf9   :  { %v1431_v4 = vpop.f32.mrf.mxu0 }
  0xfa   :  { %2115 = vmatpush.bf16.msrb.mxu1 %v3213_v28  ;;  %v1432_v6 = vadd.f32 %v1431_v4, %v1418_v3  ;;  %2073 = vmatpush.bf16.msra.mxu2 %v3273_v9  ;;  %v3261_v3 = vor.u32 %v3674_v1, %v3258_v2  ;;  %v3352_v4 = vld [vmem:[%s5499_s3 + $0x1c0] sm:$0xf]  ;;  %v3692_v1 = vld [vmem:[%s5499_s3 + $0x194] sm:$0xf] }
  0xfb   :  { %2101 = vmatpush.bf16.msrb.mxu3 %v3149_v23  ;;  %v3309_v23 = vor.u32 %v3686_v21, %v3306_v22  ;;  %v3353_v42 = vor.u32 %v3699_v5, %v3352_v4 }
  0xfc   :  { %v1635_v10 = vmul.f32 0.2, %v1432_v6 }
  0xfe   :  { %2116 = vmatpush.bf16.msrb.mxu1 %v3205_v43  ;;  %v1643_v13 = vmax.f32 %v1432_v6, %v1635_v10  ;;  %v3274_v43 = vld [vmem:[%s5499_s3 + $0x128] sm:$0xf0] }
  0xff   :  { %2102 = vmatpush.bf16.msrb.mxu3 %v3141_v38  ;;  %v3376_v38 = vld [vmem:[%s5499_s3 + $0x1f0] sm:$0xf]  ;;  %v3277_v45 = vor.u32 %v3678_v41, %v3274_v43  ;;  %v3370_v41 = vld [vmem:[%s5499_s3 + $0x1e8] sm:$0xf0] }
 0x100   :  { %v1647_v14 = vpack.c.bf16 %v1643_v13, %v1639_v12  ;;  %v3377_v54 = vor.u32 %v3705_v39, %v3376_v38  ;;  %v3697_v12 = vld [vmem:[%s5499_s3 + $0x1b4] sm:$0xf0]  ;;  %v3378_v38 = vld [vmem:[%s5499_s3 + $0x1f8] sm:$0xf0] }
 0x102   :  { %2117 = vmatpush.bf16.msrb.mxu1 %v3197_v52  ;;  %v1443_v24 = vpop.f32.mrf.mxu1  ;;  %2082 = vmatpush.bf16.msra.mxu0 %v3377_v54  ;;  %v3266_v52 = vld [vmem:[%s5499_s3 + $0x118] sm:$0xf0]  ;;  %v3702_v54 = vld [vmem:[%s5499_s3 + $0x1e4] sm:$0xf] }
 0x103   :  { %2103 = vmatpush.bf16.msrb.mxu3 %v3133_v49  ;;  %2062 = vmatmul.bf16.vlgmr.msra.gmra.mxu1 %v1647_v14  ;;  %v1444_v40 = vadd.f32 %v1443_v24, %v248_v31  ;;  %v3369_v49 = vor.u32 %v3703_v60, %v3368_v46  ;;  %v3269_v56 = vor.u32 %v3676_v51, %v3266_v52  ;;  %v3700_v46 = vld [vmem:[%s5499_s3 + $0x1d4] sm:$0xf]  ;;  %v3362_v60 = vld [vmem:[%s5499_s3 + $0x1d8] sm:$0xf0]  ;;  %v3354_v51 = vld [vmem:[%s5499_s3 + $0x1c8] sm:$0xf0] }
 0x104   :  { %v3373_v43 = vor.u32 %v3702_v54, %v3370_v41  ;;  %v3706_v54 = vld [vmem:[%s5501_s5] sm:$0xff] }
 0x105   :  { %v1471_v28 = vpop.f32.mrf.mxu0  ;;  %v3718_v41 = vld [vmem:[%s5501_s5 + $0x60] sm:$0xff] }
 0x106   :  { %2104 = vmatmul.bf16.vlgmr.msrb.gmra.mxu3 %v5165_v47  ;;  %v3677_v47 = vld [vmem:[%s5499_s3 + $0x114] sm:$0xf0]  ;;  %2083 = vmatpush.bf16.msra.mxu0 %v3369_v49  ;;  %v3698_v49 = vld [vmem:[%s5499_s3 + $0x1c4] sm:$0xf] }
 0x107   :  { %v3265_v11 = vor.u32 %v3677_v47, %v3264_v55  ;;  %v3357_v52 = vor.u32 %v3698_v49, %v3354_v51  ;;  %v3715_v49 = vld [vmem:[%s5501_s5 + $0x48] sm:$0xff] }
 0x109   :  { %2074 = vmatpush.bf16.msra.mxu2 %v3265_v11  ;;  %v1457_v30 = vpop.f32.mrf.mxu3  ;;  %v3344_v11 = vld [vmem:[%s5499_s3 + $0x1b0] sm:$0xf] }
 0x10a   :  { %v1445_v34 = vpop.f32.mrf.mxu1  ;;  %v1458_v48 = vadd.f32 %v1457_v30, %v1444_v40  ;;  %2084 = vmatpush.bf16.msra.mxu0 %v3361_v63 }
 0x10b   :  { %v1446_v57 = vadd.f32 %v1445_v34, %v248_v31  ;;  %v3691_v31 = vld [vmem:[%s5499_s3 + $0x184] sm:$0xf0] }
 0x10c   :  { %v1472_v62 = vadd.f32 %v1471_v28, %v1458_v48  ;;  %v3365_v48 = vor.u32 %v3700_v46, %v3362_v60  ;;  %v3716_v46 = vld [vmem:[%s5501_s5 + $0x50] sm:$0xff] }
 0x10d   :  { %2075 = vmatpush.bf16.msra.mxu2 %v3257_v17  ;;  %v1473_v44 = vpop.f32.mrf.mxu0  ;;  %v3336_v17 = vld [vmem:[%s5499_s3 + $0x1a0] sm:$0xf] }
 0x10e   :  { %v1485_v37 = vpop.f32.mrf.mxu2  ;;  %2085 = vmatpush.bf16.msra.mxu0 %v3353_v42  ;;  %v3337_v21 = vor.u32 %v3695_v18, %v3336_v17 }
 0x10f   :  { %v1486_v6 = vadd.f32 %v1485_v37, %v1472_v62  ;;  %v249_v37 = vperm.slane %v4960_v36, 3  ;;  %v3694_v36 = vld [vmem:[%s5499_s3 + $0x1a4] sm:$0xf] }
 0x111   :  { %2124 = vmatpush.bf16.msrb.mxu2 %v3317_v20  ;;  %v1459_v53 = vpop.f32.mrf.mxu3 }
 0x112   :  { %v1460_v0 = vadd.f32 %v1459_v53, %v1446_v57  ;;  %v3696_v57 = vld [vmem:[%s5499_s3 + $0x1b4] sm:$0xf] }
 0x113   :  { %2118 = vmatmul.bf16.vlgmr.msrb.gmra.mxu1 %v1647_v14  ;;  %v3345_v14 = vor.u32 %v3697_v12, %v3344_v11 }
 0x114   :  { %v1474_v10 = vadd.f32 %v1473_v44, %v1460_v0  ;;  %v3338_v0 = vld [vmem:[%s5499_s3 + $0x1a8] sm:$0xf0] }
 0x115   :  { %2125 = vmatpush.bf16.msrb.mxu2 %v3309_v23  ;;  %v1527_v7 = vpop.f32.mrf.mxu0  ;;  %2086 = vmatpush.bf16.msra.mxu0 %v3345_v14  ;;  %v3341_v2 = vor.u32 %v3694_v36, %v3338_v0 }
 0x116   :  { %v1487_v47 = vpop.f32.mrf.mxu2 }
 0x117   :  { %v1488_v16 = vadd.f32 %v1487_v47, %v1474_v10 }
 0x119   :  { %2126 = vmatpush.bf16.msrb.mxu2 %v3301_v27  ;;  %2087 = vmatpush.bf16.msra.mxu0 %v3337_v21 }
 0x11d   :  { %2127 = vmatpush.bf16.msrb.mxu2 %v3293_v8  ;;  %v1529_v24 = vpop.f32.mrf.mxu0  ;;  %2088 = vmatpush.bf16.msra.mxu0 %v3329_v50  ;;  %v3320_v8 = vld [vmem:[%s5499_s3 + $0x180] sm:$0xf] }
 0x11e   :  { %v3321_v34 = vor.u32 %v3691_v31, %v3320_v8  ;;  %v3712_v8 = vld [vmem:[%s5501_s5 + $0x30] sm:$0xff]  ;;  %v3711_v31 = vld [vmem:[%s5501_s5 + $0x28] sm:$0xff] }
 0x121   :  { %2128 = vmatpush.bf16.msrb.mxu2 %v3285_v35  ;;  %v3704_v35 = vld [vmem:[%s5499_s3 + $0x1f4] sm:$0xf]  ;;  %2089 = vmatpush.bf16.msra.mxu0 %v3321_v34  ;;  %v3721_v34 = vld [vmem:[%s5501_s5 + $0x78] sm:$0xff] }
 0x122   :  { %v1499_v58 = vpop.f32.mrf.mxu1  ;;  %v3381_v39 = vor.u32 %v3704_v35, %v3378_v38  ;;  %2308 = vmatpush.bf16.msra.mxu1 %v3721_v34  ;;  %v3708_v35 = vld [vmem:[%s5501_s5 + $0x10] sm:$0xff] }
 0x123   :  { %v1500_v55 = vadd.f32 %v1499_v58, %v1486_v6  ;;  %v3346_v58 = vld [vmem:[%s5499_s3 + $0x1b8] sm:$0xf0]  ;;  %v3720_v38 = vld [vmem:[%s5501_s5 + $0x70] sm:$0xff] }
 0x124   :  { %v3349_v59 = vor.u32 %v3696_v57, %v3346_v58 }
 0x125   :  { %2129 = vmatpush.bf16.msrb.mxu2 %v3277_v45  ;;  %2138 = vmatpush.bf16.msrb.mxu0 %v3381_v39  ;;  %v3707_v39 = vld [vmem:[%s5501_s5 + $0x8] sm:$0xff] }
 0x126   :  { %2309 = vmatpush.bf16.msra.mxu1 %v3720_v38 }
 0x129   :  { %2130 = vmatpush.bf16.msrb.mxu2 %v3269_v56  ;;  %v1513_v9 = vpop.f32.mrf.mxu3  ;;  %2139 = vmatpush.bf16.msrb.mxu0 %v3373_v43  ;;  %v1555_v44 = vpop.f32.mrf.mxu0  ;;  %v3717_v43 = vld [vmem:[%s5501_s5 + $0x58] sm:$0xff] }
 0x12a   :  { %v1514_v13 = vadd.f32 %v1513_v9, %v1500_v55  ;;  %v1501_v15 = vpop.f32.mrf.mxu1  ;;  %v3322_v9 = vld [vmem:[%s5499_s3 + $0x188] sm:$0xf0] }
 0x12b   :  { %v1502_v20 = vadd.f32 %v1501_v15, %v1488_v16 }
 0x12c   :  { %v1528_v19 = vadd.f32 %v1527_v7, %v1514_v13  ;;  %v3690_v7 = vld [vmem:[%s5499_s3 + $0x184] sm:$0xf] }
 0x12d   :  { %2131 = vmatpush.bf16.msrb.mxu2 %v3261_v3  ;;  %2140 = vmatpush.bf16.msrb.mxu0 %v3365_v48  ;;  %v3330_v3 = vld [vmem:[%s5499_s3 + $0x198] sm:$0xf0]  ;;  %v3325_v13 = vor.u32 %v3690_v7, %v3322_v9  ;;  %v1714_v48 = vld [vmem:[%s5502_s4] sm:$0x3] }
 0x12e   :  { %v1632_v27 = vmul.f32 0.2, %v1528_v19  ;;  %v1541_v30 = vpop.f32.mrf.mxu2  ;;  %v3333_v6 = vor.u32 %v3692_v1, %v3330_v3  ;;  %v1716_v51 = vperm.slane %v1714_v48, 0 }
 0x12f   :  { %v1542_v63 = vadd.f32 %v1541_v30, %v249_v37  ;;  %v3713_v30 = vld [vmem:[%s5501_s5 + $0x38] sm:$0xff] }
 0x130   :  { %v1640_v32 = vmax.f32 %v1528_v19, %v1632_v27  ;;  %2294 = vmatpush.bf16.msra.mxu3 %v3713_v30 }
 0x131   :  { %v1515_v22 = vpop.f32.mrf.mxu3  ;;  %2141 = vmatpush.bf16.msrb.mxu0 %v3357_v52  ;;  %v1557_v61 = vpop.f32.mrf.mxu0  ;;  %v1556_v4 = vadd.f32 %v1555_v44, %v1542_v63  ;;  %v3714_v52 = vld [vmem:[%s5501_s5 + $0x40] sm:$0xff] }
 0x132   :  { %v1516_v23 = vadd.f32 %v1515_v22, %v1502_v20 }
 0x134   :  { %v1530_v28 = vadd.f32 %v1529_v24, %v1516_v23  ;;  %2295 = vmatpush.bf16.msra.mxu3 %v3712_v8 }
 0x135   :  { %2142 = vmatpush.bf16.msrb.mxu0 %v3349_v59 }
 0x136   :  { %v1636_v29 = vmul.f32 0.2, %v1530_v28  ;;  %v1543_v45 = vpop.f32.mrf.mxu2 }
 0x137   :  { %v1544_v5 = vadd.f32 %v1543_v45, %v249_v37 }
 0x138   :  { %v1644_v33 = vmax.f32 %v1530_v28, %v1636_v29  ;;  %2296 = vmatpush.bf16.msra.mxu3 %v3711_v31 }
 0x139   :  { %2143 = vmatpush.bf16.msrb.mxu0 %v3341_v2  ;;  %v1558_v11 = vadd.f32 %v1557_v61, %v1544_v5 }
 0x13a   :  { %v1648_v40 = vpack.c.bf16 %v1644_v33, %v1640_v32  ;;  %v3710_v32 = vld [vmem:[%s5501_s5 + $0x20] sm:$0xff]  ;;  %v3709_v33 = vld [vmem:[%s5501_s5 + $0x18] sm:$0xff] }
 0x13c   :  { %2076 = vmatmul.bf16.vlgmr.msra.gmra.mxu2 %v1648_v40  ;;  %2297 = vmatpush.bf16.msra.mxu3 %v3710_v32 }
 0x13d   :  { %2144 = vmatpush.bf16.msrb.mxu0 %v3333_v6 }
 0x140   :  { %2298 = vmatpush.bf16.msra.mxu3 %v3709_v33 }
 0x141   :  { %2145 = vmatpush.bf16.msrb.mxu0 %v3325_v13 }
 0x142   :  { %v1569_v53 = vpop.f32.mrf.mxu1 }
 0x143   :  { %v1570_v10 = vadd.f32 %v1569_v53, %v1556_v4 }
 0x144   :  { %2299 = vmatpush.bf16.msra.mxu3 %v3708_v35 }
 0x148   :  { %2300 = vmatpush.bf16.msra.mxu3 %v3707_v39 }
 0x149   :  { %v1583_v62 = vpop.f32.mrf.mxu3  ;;  %v1611_v47 = vpop.f32.mrf.mxu0 }
 0x14a   :  { %v1571_v55 = vpop.f32.mrf.mxu1  ;;  %v1584_v12 = vadd.f32 %v1583_v62, %v1570_v10 }
 0x14b   :  { %v1572_v15 = vadd.f32 %v1571_v55, %v1558_v11 }
 0x14c   :  { %2132 = vmatmul.bf16.vlgmr.msrb.gmra.mxu2 %v1648_v40  ;;  %v3719_v40 = vld [vmem:[%s5501_s5 + $0x68] sm:$0xff]  ;;  %2301 = vmatpush.bf16.msra.mxu3 %v3706_v54 }
 0x14d   :  { %2310 = vmatpush.bf16.msra.mxu1 %v3719_v40 }
 0x14e   :  { %v1597_v56 = vpop.f32.mrf.mxu2 }
 0x14f   :  { %v1598_v16 = vadd.f32 %v1597_v56, %v1584_v12 }
 0x151   :  { %v1585_v14 = vpop.f32.mrf.mxu3  ;;  %v1612_v19 = vadd.f32 %v1611_v47, %v1598_v16  ;;  %v1613_v21 = vpop.f32.mrf.mxu0  ;;  %2311 = vmatpush.bf16.msra.mxu1 %v3718_v41 }
 0x152   :  { %v1586_v17 = vadd.f32 %v1585_v14, %v1572_v15 }
 0x155   :  { %2312 = vmatpush.bf16.msra.mxu1 %v3717_v43 }
 0x156   :  { %v1599_v42 = vpop.f32.mrf.mxu2 }
 0x157   :  { %v1600_v20 = vadd.f32 %v1599_v42, %v1586_v17  ;;  %v1717_v42 = vperm.slane %v1714_v48, 1 }
 0x159   :  { %v1614_v23 = vadd.f32 %v1613_v21, %v1600_v20  ;;  %2313 = vmatpush.bf16.msra.mxu1 %v3716_v46 }
 0x15d   :  { %2314 = vmatpush.bf16.msra.mxu1 %v3715_v49 }
 0x15e   :  { %v1625_v18 = vpop.f32.mrf.mxu2 }
 0x15f   :  { %v1626_v22 = vadd.f32 %v1625_v18, %v1612_v19 }
 0x161   :  { %v1633_v25 = vmul.f32 0.2, %v1626_v22  ;;  %2315 = vmatpush.bf16.msra.mxu1 %v3714_v52 }
 0x163   :  { %v1641_v28 = vmax.f32 %v1626_v22, %v1633_v25 }
 0x166   :  { %v1627_v24 = vpop.f32.mrf.mxu2 }
 0x167   :  { %v1628_v26 = vadd.f32 %v1627_v24, %v1614_v23 }
 0x169   :  { %v1637_v27 = vmul.f32 0.2, %v1628_v26  ;;  %v2049_v44 = vpop.f32.mrf.mxu3 }
 0x16a   :  { %v2050_v56 = vadd.f32 %v2049_v44, %v1716_v51 }
 0x16b   :  { %v1645_v50 = vmax.f32 %v1628_v26, %v1637_v27 }
 0x16d   :  { %v1649_v29 = vpack.c.bf16 %v1645_v50, %v1641_v28  ;;  %v3722_v50 = vld [vmem:[%s5500_s6] ss:$0 sm:$0xff] }
 0x16f   :  { %2090 = vmatmul.bf16.vlgmr.msra.gmra.mxu0 %v1649_v29 }
 0x171   :  { %v2051_v37 = vpop.f32.mrf.mxu3 }
 0x172   :  { %v2052_v61 = vadd.f32 %v2051_v37, %v1716_v51 }
 0x17f   :  { %2146 = vmatmul.bf16.vlgmr.msrb.gmra.mxu0 %v1649_v29 }
 0x180   :  { %v2063_v45 = vpop.f32.mrf.mxu1 }
 0x181   :  { %v2064_v59 = vadd.f32 %v2063_v45, %v2050_v56 }
 0x188   :  { %v2065_v53 = vpop.f32.mrf.mxu1 }
 0x189   :  { %v2066_v63 = vadd.f32 %v2065_v53, %v2052_v61  ;;  %v2105_v0 = vpop.f32.mrf.mxu3 }
 0x18a   :  { %v2106_v55 = vadd.f32 %v2105_v0, %v1717_v42 }
 0x190   :  { %v2119_v2 = vpop.f32.mrf.mxu1 }
 0x191   :  { %v2107_v11 = vpop.f32.mrf.mxu3  ;;  %v2120_v13 = vadd.f32 %v2119_v2, %v2106_v55 }
 0x192   :  { %v2108_v15 = vadd.f32 %v2107_v11, %v1717_v42 }
 0x198   :  { %v2121_v14 = vpop.f32.mrf.mxu1 }
 0x199   :  { %v2122_v18 = vadd.f32 %v2121_v14, %v2108_v15 }
 0x1bf   :  { %v2077_v60 = vpop.f32.mrf.mxu2 }
 0x1c0   :  { %v2078_v62 = vadd.f32 %v2077_v60, %v2064_v59 }
 0x1c7   :  { %v2079_v57 = vpop.f32.mrf.mxu2 }
 0x1c8   :  { %v2080_v1 = vadd.f32 %v2079_v57, %v2066_v63 }
 0x1cf   :  { %v2133_v6 = vpop.f32.mrf.mxu2 }
 0x1d0   :  { %v2134_v16 = vadd.f32 %v2133_v6, %v2120_v13 }
 0x1d7   :  { %v2135_v17 = vpop.f32.mrf.mxu2 }
 0x1d8   :  { %v2136_v20 = vadd.f32 %v2135_v17, %v2122_v18 }
 0x1ec   :  { %v2091_v58 = vpop.f32.mrf.mxu0 }
 0x1ed   :  { %v2092_v36 = vadd.f32 %v2091_v58, %v2078_v62 }
 0x1ef   :  { %v2152_v4 = vmul.f32 0.2, %v2092_v36 }
 0x1f1   :  { %v2156_v9 = vmax.f32 %v2092_v36, %v2152_v4 }
 0x1f4   :  { %v2093_v3 = vpop.f32.mrf.mxu0 }
 0x1f5   :  { %v2094_v5 = vadd.f32 %v2093_v3, %v2080_v1 }
 0x1f7   :  { %v2154_v7 = vmul.f32 0.2, %v2094_v5 }
 0x1f9   :  { %v2158_v10 = vmax.f32 %v2094_v5, %v2154_v7 }
 0x1fb   :  { %v2160_v47 = vpack.c.bf16 %v2158_v10, %v2156_v9 }
 0x1fc   :  { %v2147_v12 = vpop.f32.mrf.mxu0 }
 0x1fd   :  { %2302 = vmatmul.bf16.vlgmr.msra.gmra.mxu3 %v2160_v47  ;;  %v2148_v19 = vadd.f32 %v2147_v12, %v2134_v16 }
 0x1ff   :  { %v2153_v22 = vmul.f32 0.2, %v2148_v19 }
 0x201   :  { %v2157_v25 = vmax.f32 %v2148_v19, %v2153_v22 }
 0x204   :  { %v2149_v21 = vpop.f32.mrf.mxu0 }
 0x205   :  { %v2150_v23 = vadd.f32 %v2149_v21, %v2136_v20 }
 0x207   :  { %v2155_v24 = vmul.f32 0.2, %v2150_v23 }
 0x209   :  { %v2159_v26 = vmax.f32 %v2150_v23, %v2155_v24 }
 0x20b   :  { %v2161_v27 = vpack.c.bf16 %v2159_v26, %v2157_v25 }
 0x20d   :  { %2316 = vmatmul.bf16.vlgmr.msra.gmra.mxu1 %v2161_v27 }
 0x280   :  { %v2303_v28 = vpop.f32.mrf.mxu3 }
 0x281   :  { %v2304_v29 = vadd.f32 %v3722_v50, %v2303_v28 }
 0x288   :  { %v2305_v32 = vpop.f32.mrf.mxu3 }
 0x289   :  { %v2306_v34 = vadd.f32 %v3722_v50, %v2305_v32 }
 0x28a   :  { %v2317_v30 = vpop.f32.mrf.mxu1 }
 0x28b   :  { %v2318_v8 = vadd.f32 %v2317_v30, %v2304_v29 }
 0x28d   :  { %v2322_v31 = vsub.f32 0.0, %v2318_v8 }
 0x28f   :  { %v2324_v33 = vmul.f32 1.442695, %v2322_v31 }
 0x291   :  { %3723 = vpow2.f32 %v2324_v33 }
 0x292   :  { %v2319_v35 = vpop.f32.mrf.mxu1 }
 0x293   :  { %v2320_v38 = vadd.f32 %v2319_v35, %v2306_v34 }
 0x295   :  { %v2323_v39 = vsub.f32 0.0, %v2320_v38 }
 0x297   :  { %v3724_v40 = vpop.eup %3723  ;;  %v2326_v54 = vmul.f32 1.442695, %v2323_v39 }
 0x298   :  { %v2328_v41 = vadd.f32 1.0, %v3724_v40 }
 0x299   :  { %3725 = vpow2.f32 %v2326_v54 }
 0x29a   :  { %3727 = vrcp.f32 %v2328_v41 }
 0x29f   :  { %v3726_v43 = vpop.eup %3725 }
 0x2a0   :  { %v3728_v44 = vpop.eup %3727  ;;  %v2329_v45 = vadd.f32 1.0, %v3726_v43 }
 0x2a1   :  { %2332 = vst [vmem:[%s5503_s7] sm:$0xff] %v3728_v44 }
 0x2a2   :  { %3729 = vrcp.f32 %v2329_v45 }
 0x2a8   :  { %v3730_v46 = vpop.eup %3729 }
 0x2a9   :  { %2333 = vst [vmem:[%s5503_s7 + $0x8] sm:$0xff] %v3730_v46 }

</bundles_post_ra>
